<compile_context>
chip_gen: v5e
topology: v5e:2x2
jax: 0.10.0
libtpu: 0.0.40
codegen_flags: <defaults>
</compile_context>

<pallas_src>
import math
from functools import partial

import jax
import jax.numpy as jnp
import numpy as np
from jax.experimental import pallas as pl
from jax.experimental.pallas import tpu as pltpu

LN_EPS = 1e-6
_MiB = 1024 * 1024
SMALL_C_THRESHOLD = 64


def _round_up(x, m):
    return ((x + m - 1) // m) * m


def _gelu(x, approximate):
    if approximate:
        # tanh approximation -> EUP slot (only if exact-PyTorch numerics can be relaxed)
        return jax.nn.gelu(x, approximate=True)
    # nn.GELU default: 0.5 * x * (1 + erf(x / sqrt(2)))
    return 0.5 * x * (1.0 + jax.lax.erf(x * jnp.float32(1.0 / math.sqrt(2.0))))


# --------------------------- kernels ---------------------------
def fpn1_kernel_fused(x_ref, w1_ref, b1_ref, g4_ref, bt4_ref, avg_ref, w2bd_ref,
                      b2f_ref, o_ref, *, approximate_gelu):
    """Small-C fused path.

    x_ref  : (tile, C)      input pixels, channels on the lane axis
    w1_ref : (C, 4C)        conv1 taps packed along columns, tap k1 = kh1*2 + kw1
    b1_ref : (1, 4C)        conv1 bias tiled per tap (f32)
    g4_ref/bt4_ref : (1,4C) LayerNorm affine tiled per tap (f32)
    avg_ref: (4C, 4C)       block-averaging matrix (1/C within each tap block, f32)
    w2bd_ref:(4C, 16C)      conv2 taps as a block-diagonal matrix (block k1 = w2p)
    b2f_ref: (1, 16C)       conv2 bias tiled over all 16 tap combos (f32)
    o_ref  : (tile, 16C)    lane-dense output, column = (k1*4 + k2)*C + c
    """
    # ConvTranspose2d #1: all 4 taps in one wide MXU matmul, f32 accumulation.
    s = jnp.dot(x_ref[...], w1_ref[...],
                preferred_element_type=jnp.float32) + b1_ref[...]
    # Per-tap LayerNorm statistics over the full (tile, 4C) slab via block-averaging
    # matmuls (MXU slack), two-pass variance for accuracy.
    avg = avg_ref[...]
    mean = jnp.dot(s, avg, preferred_element_type=jnp.float32)
    d = s - mean
    var = jnp.dot(d * d, avg, preferred_element_type=jnp.float32)
    a = d * jax.lax.rsqrt(var + LN_EPS) * g4_ref[...] + bt4_ref[...]
    a = _gelu(a, approximate_gelu)
    # ConvTranspose2d #2: one block-diagonal matmul over all 16 (k1,k2) tap combos,
    # single full-width (lane-dense) store.
    y = jnp.dot(a.astype(w2bd_ref.dtype), w2bd_ref[...],
                preferred_element_type=jnp.float32) + b2f_ref[...]
    o_ref[...] = y.astype(o_ref.dtype)


def fpn1_kernel_loop(x_ref, w1_ref, b1_ref, g_ref, bt_ref, w2_ref, b2_ref, o_ref, *,
                     approximate_gelu):
    """Large-C path (C >= 128): per-tap slices are already lane-aligned."""
    C = g_ref.shape[-1]
    tile = x_ref.shape[0]
    s = jnp.dot(x_ref[...], w1_ref[...],
                preferred_element_type=jnp.float32) + b1_ref[...]
    gamma = g_ref[...]
    beta = bt_ref[...]
    w2 = w2_ref[...]
    b2b = jnp.broadcast_to(b2_ref[...], (tile, 4 * C))  # hoisted out of the loop
    for k1 in range(4):
        s1 = s[:, k1 * C:(k1 + 1) * C]
        mean = jnp.mean(s1, axis=-1, keepdims=True)
        d = s1 - mean
        var = jnp.mean(d * d, axis=-1, keepdims=True)
        a = d * jax.lax.rsqrt(var + LN_EPS) * gamma + beta
        a = _gelu(a, approximate_gelu)
        y = jnp.dot(a.astype(w2.dtype), w2, preferred_element_type=jnp.float32) + b2b
        o_ref[:, k1 * 4 * C:(k1 + 1) * 4 * C] = y.astype(o_ref.dtype)


# --------------------------- hardware helpers ---------------------------
def _tpu_info():
    try:
        return pltpu.get_tpu_info()
    except Exception:
        return None


def _vmem_limit_bytes():
    """Generation-aware scoped-VMEM budget: <=100 MiB, ~8 MiB below physical."""
    info = _tpu_info()
    cap = getattr(info, "vmem_capacity_bytes", None) if info is not None else None
    if not cap:
        cap = 64 * _MiB  # conservative (v7x-sized) fallback
    return int(min(100 * _MiB, max(16 * _MiB, int(cap) - 8 * _MiB)))


def _num_tensorcores():
    info = _tpu_info()
    if info is not None:
        for attr in ("num_cores", "core_count", "num_tensorcores"):
            v = getattr(info, attr, None)
            if v:
                return int(v)
    try:
        v = getattr(jax.devices()[0], "num_cores", None)
        if v:
            return int(v)
    except Exception:
        pass
    return 1


def _pick_tile(n_rows, c, vmem_limit, in_bytes, out_bytes, resident_bytes, row_mult,
               num_cores):
    """Biggest row tile whose double-buffered input/output blocks + f32 intermediates
    fit the VMEM budget left after the resident weights.  Only force multiple grid
    steps when there is more than one TensorCore to shard across."""
    per_row = 2 * c * in_bytes + 2 * 16 * c * out_bytes + 8 * (4 * c) * 4
    budget = max(vmem_limit - resident_bytes - 4 * _MiB, 2 * _MiB)
    cap = max(row_mult, (budget // per_row) // row_mult * row_mult)
    cap = min(cap, 2048)
    min_steps = 2 * num_cores if num_cores > 1 else 1
    want = _round_up(-(-n_rows // min_steps), row_mult)
    return max(row_mult, min(cap, want))


# --------------------------- parameter packing (do once, reuse) ---------------------------
def pack_params(params, *, compute_dtype=jnp.bfloat16):
    """Pre-pack weights/biases once (outside the per-call wrapper)."""
    w1s, b1, gamma, beta, w2s, b2 = params
    C = w1s.shape[1]
    # wide (C, 4C): column block k = tap k's (Cin, Cout), tap = kh*2 + kw
    w1p = jnp.transpose(w1s, (1, 0, 2)).reshape(C, 4 * C).astype(compute_dtype)
    w2p = jnp.transpose(w2s, (1, 0, 2)).reshape(C, 4 * C).astype(compute_dtype)
    b1p = jnp.tile(b1.astype(jnp.float32), (1, 4))
    gammaf = gamma.astype(jnp.float32)
    betaf = beta.astype(jnp.float32)

    packed = {"C": C, "compute_dtype": compute_dtype, "w1p": w1p, "b1p": b1p}
    if C <= SMALL_C_THRESHOLD:
        packed["gamma4"] = jnp.tile(gammaf, (1, 4))
        packed["beta4"] = jnp.tile(betaf, (1, 4))
        # block-averaging matrix for per-tap LN stats (kept f32 for accurate stats)
        packed["avg"] = jnp.kron(jnp.eye(4, dtype=jnp.float32),
                                 jnp.full((C, C), 1.0 / C, jnp.float32))
        # block-diagonal conv2: rows [k1*C:(k1+1)*C] x cols [k1*4C:(k1+1)*4C] = w2p
        w2bd = jnp.zeros((4 * C, 16 * C), compute_dtype)
        for k1 in range(4):
            w2bd = w2bd.at[k1 * C:(k1 + 1) * C, k1 * 4 * C:(k1 + 1) * 4 * C].set(w2p)
        packed["w2bd"] = w2bd
        packed["b2full"] = jnp.tile(b2.astype(jnp.float32), (1, 16))
    else:
        packed["gamma"] = gammaf
        packed["beta"] = betaf
        packed["w2p"] = w2p
        packed["b2p"] = jnp.tile(b2.astype(jnp.float32), (1, 4))
    return packed


# --------------------------- forward ---------------------------
def vitup1_forward_packed(x_nchw, packed, *, tile=None, out_dtype=jnp.bfloat16,
                          output_layout="NCHW", approximate_gelu=False):
    """features[0] of VITUp_1.forward: fpn1(x). Input NCHW; output NCHW (or NHWC)."""
    C = packed["C"]
    compute_dtype = packed["compute_dtype"]
    B, Cin, H, W = x_nchw.shape
    assert Cin == C, (Cin, C)
    N = B * H * W

    x_flat = jnp.transpose(x_nchw, (0, 2, 3, 1)).reshape(N, C).astype(compute_dtype)

    in_bytes = jnp.dtype(compute_dtype).itemsize
    out_bytes = jnp.dtype(out_dtype).itemsize
    row_mult = 16 if (in_bytes < 4 or out_bytes < 4) else 8
    vmem_limit = _vmem_limit_bytes()
    small_c = C <= SMALL_C_THRESHOLD

    if small_c:
        resident_bytes = (packed["w1p"].nbytes + packed["avg"].nbytes +
                          packed["w2bd"].nbytes + packed["b1p"].nbytes +
                          packed["b2full"].nbytes + packed["gamma4"].nbytes +
                          packed["beta4"].nbytes)
    else:
        resident_bytes = (packed["w1p"].nbytes + packed["w2p"].nbytes +
                          packed["b1p"].nbytes + packed["b2p"].nbytes +
                          packed["gamma"].nbytes + packed["beta"].nbytes)

    if tile is None:
        tile = _pick_tile(N, C, vmem_limit, in_bytes, out_bytes, resident_bytes,
                          row_mult, _num_tensorcores())
    n_pad = _round_up(N, tile)
    if n_pad != N:
        x_flat = jnp.pad(x_flat, ((0, n_pad - N), (0, 0)))

    resident = pl.BlockSpec(memory_space=pltpu.MemorySpace.VMEM)
    x_spec = pl.BlockSpec((tile, C), lambda i: (i, 0))
    out_spec = pl.BlockSpec((tile, 16 * C), lambda i: (i, 0))

    if small_c:
        kernel = partial(fpn1_kernel_fused, approximate_gelu=approximate_gelu)
        args = (x_flat, packed["w1p"], packed["b1p"], packed["gamma4"],
                packed["beta4"], packed["avg"], packed["w2bd"], packed["b2full"])
        in_specs = [x_spec] + [resident] * 7
    else:
        kernel = partial(fpn1_kernel_loop, approximate_gelu=approximate_gelu)
        args = (x_flat, packed["w1p"], packed["b1p"], packed["gamma"],
                packed["beta"], packed["w2p"], packed["b2p"])
        in_specs = [x_spec] + [resident] * 6

    out = pl.pallas_call(
        kernel,
        out_shape=jax.ShapeDtypeStruct((n_pad, 16 * C), out_dtype),
        grid_spec=pltpu.PrefetchScalarGridSpec(
            num_scalar_prefetch=0,
            grid=(n_pad // tile,),
            in_specs=in_specs,
            out_specs=out_spec,
        ),
        compiler_params=pltpu.CompilerParams(
            dimension_semantics=("parallel",),
            vmem_limit_bytes=vmem_limit,
        ),
    )(*args)

    # (N, 16C) -> (B, H, W, kh1, kw1, kh2, kw2, C); output pixel = (4h+2kh1+kh2, 4w+2kw1+kw2)
    out = out[:N].reshape(B, H, W, 2, 2, 2, 2, C)
    if output_layout == "NHWC":
        # channels stay minor: cheaper sub-pixel interleave for NHWC consumers
        out = jnp.transpose(out, (0, 1, 3, 5, 2, 4, 6, 7))
        return out.reshape(B, 4 * H, 4 * W, C)
    out = jnp.transpose(out, (0, 7, 1, 3, 5, 2, 4, 6))  # (B,C,H,kh1,kh2,W,kw1,kw2)
    return out.reshape(B, C, 4 * H, 4 * W)


def vitup1_forward(x_nchw, params, *, compute_dtype=jnp.bfloat16, **kwargs):
    """Convenience wrapper (packs weights per call; prefer pack_params + _packed)."""
    return vitup1_forward_packed(x_nchw, pack_params(params, compute_dtype=compute_dtype),
                                 **kwargs)


# --------------------------- pure-JAX reference ---------------------------
def _conv_t_2x2_s2_ref(x, w, b):
    # x: (B,Cin,H,W), w: (Cin,Cout,2,2) [PyTorch ConvTranspose2d layout], b: (Cout,)
    B, Cin, H, W = x.shape
    Cout = w.shape[1]
    y = jnp.einsum("bihw,iokl->bohwkl", x, w) + b[None, :, None, None, None, None]
    y = jnp.transpose(y, (0, 1, 2, 4, 3, 5)).reshape(B, Cout, 2 * H, 2 * W)
    return y


def vitup1_reference(x, params):
    w1s, b1, gamma, beta, w2s, b2 = params
    C = x.shape[1]
    w1 = jnp.transpose(w1s.reshape(2, 2, C, C), (2, 3, 0, 1))
    w2 = jnp.transpose(w2s.reshape(2, 2, C, C), (2, 3, 0, 1))
    y = _conv_t_2x2_s2_ref(x, w1, b1[0])
    yh = jnp.transpose(y, (0, 2, 3, 1))
    mean = yh.mean(-1, keepdims=True)
    var = ((yh - mean) ** 2).mean(-1, keepdims=True)
    yh = (yh - mean) / jnp.sqrt(var + LN_EPS) * gamma[0] + beta[0]
    yh = _gelu(yh, approximate=False)
    y = jnp.transpose(yh, (0, 3, 1, 2))
    return _conv_t_2x2_s2_ref(y, w2, b2[0])


# --------------------------- parameter construction ---------------------------
def make_params(key, embed_dim):
    C = embed_dim
    k = jax.random.split(key, 6)
    scale = 1.0 / math.sqrt(C * 4)
    # ConvTranspose2d weights stored as stacked taps: (4, Cin, Cout), tap = kh*2 + kw
    w1s = jax.random.normal(k[0], (4, C, C), jnp.float32) * scale
    b1 = jax.random.normal(k[1], (1, C), jnp.float32) * 0.02
    gamma = 1.0 + jax.random.normal(k[2], (1, C), jnp.float32) * 0.05
    beta = jax.random.normal(k[3], (1, C), jnp.float32) * 0.02
    w2s = jax.random.normal(k[4], (4, C, C), jnp.float32) * scale
    b2 = jax.random.normal(k[5], (1, C), jnp.float32) * 0.02
    return (w1s, b1, gamma, beta, w2s, b2)


if __name__ == "__main__":
    key = jax.random.PRNGKey(0)
    kx, kp, kx2, kp2 = jax.random.split(key, 4)

    # ---- small-C shape (fused block-diag path), consistent with the module ----
    B, C, H, W = 2, 32, 8, 8
    x = jax.random.normal(kx, (B, C, H, W), jnp.float32)
    params = make_params(kp, C)
    ref = jax.block_until_ready(vitup1_reference(x, params))

    # f32 everything: must match the exact-erf / f32 reference tightly.
    packed_f32 = pack_params(params, compute_dtype=jnp.float32)
    out_f32 = jax.block_until_ready(
        vitup1_forward_packed(x, packed_f32, out_dtype=jnp.float32))
    assert out_f32.shape == (B, C, 4 * H, 4 * W), out_f32.shape
    np.testing.assert_allclose(np.asarray(out_f32), np.asarray(ref),
                               rtol=1e-4, atol=1e-4)

    # Recommended default path: bf16 MXU dots + bf16 output (f32 LN/GELU, f32 accumulation).
    packed_bf16 = pack_params(params)  # compute_dtype defaults to bfloat16
    out_bf16 = jax.block_until_ready(vitup1_forward_packed(x, packed_bf16))
    np.testing.assert_allclose(np.asarray(out_bf16.astype(jnp.float32)),
                               np.asarray(ref), rtol=1e-1, atol=1e-1)

    # NHWC output option (skips the channel-major interleave).
    out_nhwc = jax.block_until_ready(
        vitup1_forward_packed(x, packed_bf16, output_layout="NHWC"))
    np.testing.assert_allclose(np.asarray(out_nhwc.astype(jnp.float32)),
                               np.asarray(jnp.transpose(ref, (0, 2, 3, 1))),
                               rtol=1e-1, atol=1e-1)

    # ---- large-C shape (per-tap lane-aligned loop path) ----
    B2, C2, H2, W2 = 1, 128, 4, 4
    x2 = jax.random.normal(kx2, (B2, C2, H2, W2), jnp.float32)
    params2 = make_params(kp2, C2)
    ref2 = jax.block_until_ready(vitup1_reference(x2, params2))
    packed2 = pack_params(params2, compute_dtype=jnp.float32)
    out2 = jax.block_until_ready(
        vitup1_forward_packed(x2, packed2, out_dtype=jnp.float32))
    np.testing.assert_allclose(np.asarray(out2), np.asarray(ref2),
                               rtol=1e-3, atol=1e-3)

    print("KERNEL_OK")
</pallas_src>

<mosaic_0001>
module attributes {stable_mosaic.version = 11 : i64} {
  func.func @fpn1_kernel_fused(%arg0: i32, %arg1: memref<128x32xf32, #tpu.memory_space<vmem>>, %arg2: memref<32x128xf32, #tpu.memory_space<vmem>>, %arg3: memref<1x128xf32, #tpu.memory_space<vmem>>, %arg4: memref<1x128xf32, #tpu.memory_space<vmem>>, %arg5: memref<1x128xf32, #tpu.memory_space<vmem>>, %arg6: memref<128x128xf32, #tpu.memory_space<vmem>>, %arg7: memref<128x512xf32, #tpu.memory_space<vmem>>, %arg8: memref<1x512xf32, #tpu.memory_space<vmem>>, %arg9: memref<128x512xf32, #tpu.memory_space<vmem>>) attributes {dimension_semantics = [#tpu.dimension_semantics<parallel>], iteration_bounds = array<i64: 1>, scalar_prefetch = 0 : i64, scratch_operands = 0 : i64, tpu.core_type = #tpu.core_type<tc>, window_params = [{transform_indices = @transform_0, window_bounds = array<i64: 128, 32>}, {pipeline_mode = #tpu.pipeline_mode<synchronous>, transform_indices = @transform_1, window_bounds = array<i64: 32, 128>}, {pipeline_mode = #tpu.pipeline_mode<synchronous>, transform_indices = @transform_2, window_bounds = array<i64: 1, 128>}, {pipeline_mode = #tpu.pipeline_mode<synchronous>, transform_indices = @transform_3, window_bounds = array<i64: 1, 128>}, {pipeline_mode = #tpu.pipeline_mode<synchronous>, transform_indices = @transform_4, window_bounds = array<i64: 1, 128>}, {pipeline_mode = #tpu.pipeline_mode<synchronous>, transform_indices = @transform_5, window_bounds = array<i64: 128, 128>}, {pipeline_mode = #tpu.pipeline_mode<synchronous>, transform_indices = @transform_6, window_bounds = array<i64: 128, 512>}, {pipeline_mode = #tpu.pipeline_mode<synchronous>, transform_indices = @transform_7, window_bounds = array<i64: 1, 512>}, {transform_indices = @transform_8, window_bounds = array<i64: 128, 512>}]} {
    %c0 = arith.constant 0 : index
    %c0_0 = arith.constant 0 : index
    %0 = vector.load %arg1[%c0, %c0_0] : memref<128x32xf32, #tpu.memory_space<vmem>>, vector<128x32xf32>
    %c0_1 = arith.constant 0 : index
    %c0_2 = arith.constant 0 : index
    %1 = vector.load %arg2[%c0_1, %c0_2] : memref<32x128xf32, #tpu.memory_space<vmem>>, vector<32x128xf32>
    %cst = arith.constant dense<0.000000e+00> : vector<128x128xf32>
    %2 = tpu.matmul %0, %1, %cst {dimension_numbers = #tpu.dot_dimension_numbers<[1], [0], [0], [1], [0, 0, 1, 1], [], []>} : vector<128x32xf32>, vector<32x128xf32>, vector<128x128xf32> -> vector<128x128xf32>
    %c0_3 = arith.constant 0 : index
    %c0_4 = arith.constant 0 : index
    %3 = vector.load %arg3[%c0_3, %c0_4] : memref<1x128xf32, #tpu.memory_space<vmem>>, vector<1x128xf32>
    %4 = vector.broadcast %3 : vector<1x128xf32> to vector<128x128xf32>
    %5 = arith.addf %2, %4 : vector<128x128xf32>
    %c0_5 = arith.constant 0 : index
    %c0_6 = arith.constant 0 : index
    %6 = vector.load %arg6[%c0_5, %c0_6] : memref<128x128xf32, #tpu.memory_space<vmem>>, vector<128x128xf32>
    %cst_7 = arith.constant dense<0.000000e+00> : vector<128x128xf32>
    %7 = tpu.matmul %5, %6, %cst_7 {dimension_numbers = #tpu.dot_dimension_numbers<[1], [0], [0], [1], [0, 0, 1, 1], [], []>} : vector<128x128xf32>, vector<128x128xf32>, vector<128x128xf32> -> vector<128x128xf32>
    %8 = arith.subf %5, %7 : vector<128x128xf32>
    %9 = arith.mulf %8, %8 : vector<128x128xf32>
    %cst_8 = arith.constant dense<0.000000e+00> : vector<128x128xf32>
    %10 = tpu.matmul %9, %6, %cst_8 {dimension_numbers = #tpu.dot_dimension_numbers<[1], [0], [0], [1], [0, 0, 1, 1], [], []>} : vector<128x128xf32>, vector<128x128xf32>, vector<128x128xf32> -> vector<128x128xf32>
    %cst_9 = arith.constant 9.99999997E-7 : f32
    %11 = vector.broadcast %cst_9 : f32 to vector<128x128xf32>
    %12 = arith.addf %10, %11 : vector<128x128xf32>
    %13 = math.rsqrt %12 : vector<128x128xf32>
    %14 = arith.mulf %8, %13 : vector<128x128xf32>
    %c0_10 = arith.constant 0 : index
    %c0_11 = arith.constant 0 : index
    %15 = vector.load %arg4[%c0_10, %c0_11] : memref<1x128xf32, #tpu.memory_space<vmem>>, vector<1x128xf32>
    %16 = vector.broadcast %15 : vector<1x128xf32> to vector<128x128xf32>
    %17 = arith.mulf %14, %16 : vector<128x128xf32>
    %c0_12 = arith.constant 0 : index
    %c0_13 = arith.constant 0 : index
    %18 = vector.load %arg5[%c0_12, %c0_13] : memref<1x128xf32, #tpu.memory_space<vmem>>, vector<1x128xf32>
    %19 = vector.broadcast %18 : vector<1x128xf32> to vector<128x128xf32>
    %20 = arith.addf %17, %19 : vector<128x128xf32>
    %cst_14 = arith.constant 5.000000e-01 : f32
    %21 = vector.broadcast %cst_14 : f32 to vector<128x128xf32>
    %22 = arith.mulf %21, %20 : vector<128x128xf32>
    %cst_15 = arith.constant 0.707106769 : f32
    %23 = vector.broadcast %cst_15 : f32 to vector<128x128xf32>
    %24 = arith.mulf %20, %23 : vector<128x128xf32>
    %25 = math.erf %24 : vector<128x128xf32>
    %cst_16 = arith.constant 1.000000e+00 : f32
    %26 = vector.broadcast %cst_16 : f32 to vector<128x128xf32>
    %27 = arith.addf %26, %25 : vector<128x128xf32>
    %28 = arith.mulf %22, %27 : vector<128x128xf32>
    %c0_17 = arith.constant 0 : index
    %c0_18 = arith.constant 0 : index
    %29 = vector.load %arg7[%c0_17, %c0_18] : memref<128x512xf32, #tpu.memory_space<vmem>>, vector<128x512xf32>
    %cst_19 = arith.constant dense<0.000000e+00> : vector<128x512xf32>
    %30 = tpu.matmul %28, %29, %cst_19 {dimension_numbers = #tpu.dot_dimension_numbers<[1], [0], [0], [1], [0, 0, 1, 1], [], []>} : vector<128x128xf32>, vector<128x512xf32>, vector<128x512xf32> -> vector<128x512xf32>
    %c0_20 = arith.constant 0 : index
    %c0_21 = arith.constant 0 : index
    %31 = vector.load %arg8[%c0_20, %c0_21] : memref<1x512xf32, #tpu.memory_space<vmem>>, vector<1x512xf32>
    %32 = vector.broadcast %31 : vector<1x512xf32> to vector<128x512xf32>
    %33 = arith.addf %30, %32 : vector<128x512xf32>
    %c0_22 = arith.constant 0 : index
    %c0_23 = arith.constant 0 : index
    %34 = vector.load %arg9[%c0_22, %c0_23] : memref<128x512xf32, #tpu.memory_space<vmem>>, vector<128x512xf32>
    tpu.vector_store %arg9[%c0_22, %c0_23], %33 {strides = array<i32>} : memref<128x512xf32, #tpu.memory_space<vmem>>, vector<128x512xf32>,
    return
  }
  func.func @transform_0(%arg0: i32) -> (i32, i32) {
    %c0_i32 = arith.constant 0 : i32
    %c0_i32_0 = arith.constant 0 : i32
    return %arg0, %c0_i32 : i32, i32
  }
  func.func @transform_1(%arg0: i32) -> (i32, i32) {
    %c0_i32 = arith.constant 0 : i32
    %c0_i32_0 = arith.constant 0 : i32
    %c0_i32_1 = arith.constant 0 : i32
    return %c0_i32, %c0_i32_0 : i32, i32
  }
  func.func @transform_2(%arg0: i32) -> (i32, i32) {
    %c0_i32 = arith.constant 0 : i32
    %c0_i32_0 = arith.constant 0 : i32
    %c0_i32_1 = arith.constant 0 : i32
    return %c0_i32, %c0_i32_0 : i32, i32
  }
  func.func @transform_3(%arg0: i32) -> (i32, i32) {
    %c0_i32 = arith.constant 0 : i32
    %c0_i32_0 = arith.constant 0 : i32
    %c0_i32_1 = arith.constant 0 : i32
    return %c0_i32, %c0_i32_0 : i32, i32
  }
  func.func @transform_4(%arg0: i32) -> (i32, i32) {
    %c0_i32 = arith.constant 0 : i32
    %c0_i32_0 = arith.constant 0 : i32
    %c0_i32_1 = arith.constant 0 : i32
    return %c0_i32, %c0_i32_0 : i32, i32
  }
  func.func @transform_5(%arg0: i32) -> (i32, i32) {
    %c0_i32 = arith.constant 0 : i32
    %c0_i32_0 = arith.constant 0 : i32
    %c0_i32_1 = arith.constant 0 : i32
    return %c0_i32, %c0_i32_0 : i32, i32
  }
  func.func @transform_6(%arg0: i32) -> (i32, i32) {
    %c0_i32 = arith.constant 0 : i32
    %c0_i32_0 = arith.constant 0 : i32
    %c0_i32_1 = arith.constant 0 : i32
    return %c0_i32, %c0_i32_0 : i32, i32
  }
  func.func @transform_7(%arg0: i32) -> (i32, i32) {
    %c0_i32 = arith.constant 0 : i32
    %c0_i32_0 = arith.constant 0 : i32
    %c0_i32_1 = arith.constant 0 : i32
    return %c0_i32, %c0_i32_0 : i32, i32
  }
  func.func @transform_8(%arg0: i32) -> (i32, i32) {
    %c0_i32 = arith.constant 0 : i32
    %c0_i32_0 = arith.constant 0 : i32
    return %arg0, %c0_i32 : i32, i32
  }
}

</mosaic_0001>

<bundles_post_ra>
// kernel: tpu_custom_call.1
= control target key start
LH: loop header
LB: loop body
LE: loop exit
PB: predicated region body
PF: predicated region fallthrough
CT: control target
= control target key end

     0   :  { %13 = vsyncpa [#allocation3], 0  ;;  %s3260_s0 = inlined_call_operand.vmem [shape: f32[128,32], index: 0, kind: input, shape index: {}]   ;;  %s3261_s1 = inlined_call_operand.vmem [shape: f32[32,128], index: 1, kind: input, shape index: {}]   ;;  %s3262_s2 = inlined_call_operand.hbm [shape: f32[1,128], index: 2, kind: input, shape index: {}]   ;;  %s3263_s3 = inlined_call_operand.hbm [shape: f32[1,128], index: 3, kind: input, shape index: {}]   ;;  %s3264_s4 = inlined_call_operand.hbm [shape: f32[1,128], index: 4, kind: input, shape index: {}]   ;;  %s3265_s5 = inlined_call_operand.vmem [shape: f32[128,128], index: 5, kind: input, shape index: {}]   ;;  %s3266_s6 = inlined_call_operand.hbm [shape: f32[128,512], index: 6, kind: input, shape index: {}]   ;;  %s3267_s7 = inlined_call_operand.vmem [shape: f32[1,512], index: 7, kind: input, shape index: {}]   ;;  %s3268_s8 = inlined_call_operand.hbm [shape: f32[128,512], index: 8, kind: output, shape index: {}]  }
   0x1   :  { %14 = vsyncpa [#allocation6], 0 }
   0x2   :  { %15 = vsyncpa [#allocation9], 0  ;;  %s37_s29 = sshll.u32 %s3263_s3, 4  ;;  %s38_s29 = int_to_ptr.hbm [resolvable:$true] %s37_s29 }
   0x3   :  { %16 = vsyncpa [#allocation4], 0  ;;  %s2010_s30 = smov [#allocation5]   ;;  %s26_s12 = sshll.u32 %s3262_s2, 4  ;;  %s27_s12 = int_to_ptr.hbm [resolvable:$true] %s26_s12 }
   0x4   :  { %s39_s9 = sshll.u32 %s2010_s30, 4  ;;  %s2011_s13 = smov [#allocation2]   ;;  %s40_s9 = int_to_ptr.vmem [resolvable:$true] %s39_s9 }
   0x5   :  { %42 = dma.hbm_to_vmem [thread:$0]  %s38_s29, 16, %s40_s9, [#allocation6]  }
   0x6   :  { %s28_s14 = sshll.u32 %s2011_s13, 4  ;;  %s48_s17 = sshll.u32 %s3264_s4, 4  ;;  %s29_s14 = int_to_ptr.vmem [resolvable:$true] %s28_s14  ;;  %s49_s17 = int_to_ptr.hbm [resolvable:$true] %s48_s17 }
   0x7   :  { %31 = dma.hbm_to_vmem [thread:$0]  %s27_s12, 16, %s29_s14, [#allocation3]  }
   0x8   :  { %s60_s19 = sshll.u32 %s3266_s6, 4  ;;  %s2012_s20 = smov [#allocation7]   ;;  %s61_s19 = int_to_ptr.hbm [resolvable:$true] %s60_s19 }
   0x9   :  { %s50_s21 = sshll.u32 %s2012_s20, 4  ;;  %s2013_s2 = smov [#allocation8]   ;;  %s51_s21 = int_to_ptr.vmem [resolvable:$true] %s50_s21 }
   0xa   :  { %53 = dma.hbm_to_vmem [thread:$0]  %s49_s17, 16, %s51_s21, [#allocation6]  }
   0xb   :  { %s62_s22 = sshll.u32 %s2013_s2, 4  ;;  %s2014_s23 = smov 512   ;;  %s63_s22 = int_to_ptr.vmem [resolvable:$true] %s62_s22 }
   0xc   :  { %s2015_s24 = smov 32  }
   0xd   :  { %68 = dma.hbm_to_vmem [thread:$0]  %s61_s19, 8192, %s63_s22, [#allocation9], %s2014_s23, %s2014_s23, %s2015_s24  }
   0xe   :  { %2002 = dma.done.wait [#allocation3], 16  }
   0xf   :  { %2003 = vsyncadd [#allocation3], 4294967280 }
  0x10   :  { %2004 = dma.done.wait [#allocation6], 32  }
  0x11   :  { %2005 = vsyncadd [#allocation6], 4294967264 }
  0x12   :  { %2006 = dma.done.wait [#allocation9], 8192  }
  0x13   :  { %2007 = vsyncadd [#allocation9], 4294959104  ;;  %v106_v0 = vld [vmem:[%s3261_s1 + $0x18] sm:$0xff]  ;;  %v105_v1 = vld [vmem:[%s3261_s1 + $0x10] sm:$0xff]  ;;  %vm111_vm0 = vcmask 261120   ;;  %s1727_s4 = sshll.u32 %s3268_s8, 4  ;;  %s1728_s4 = int_to_ptr.hbm [resolvable:$true] %s1727_s4 }
  0x14   :  { %172 = vmatpush.msra.mxu0 %v106_v0  ;;  %v104_v2 = vld [vmem:[%s3261_s1 + $0x8] sm:$0xff]  ;;  %v103_v3 = vld [vmem:[%s3261_s1] sm:$0xff]  ;;  %v89_v6 = vld [vmem:[%s3260_s0 + $0x10] sm:$0xff] }
  0x15   :  { %v87_v4 = vld [vmem:[%s3260_s0] sm:$0xff]  ;;  %v88_v5 = vld [vmem:[%s3260_s0 + $0x8] sm:$0xff]  ;;  %v90_v7 = vld [vmem:[%s3260_s0 + $0x18] sm:$0xff] }
  0x16   :  { %173 = vmatpush.msra.mxu0 %v105_v1  ;;  %v91_v8 = vld [vmem:[%s3260_s0 + $0x20] sm:$0xff]  ;;  %v92_v9 = vld [vmem:[%s3260_s0 + $0x28] sm:$0xff]  ;;  %v93_v10 = vld [vmem:[%s3260_s0 + $0x30] sm:$0xff] }
  0x17   :  { %v94_v11 = vld [vmem:[%s3260_s0 + $0x38] sm:$0xff]  ;;  %v95_v12 = vld [vmem:[%s3260_s0 + $0x40] sm:$0xff]  ;;  %v2133_v14 = vld [vmem:[%s3265_s5 + $0x70] sm:$0xff] }
  0x18   :  { %174 = vmatpush.msra.mxu0 %v104_v2  ;;  %v2128_v13 = vld [vmem:[%s3265_s5 + $0x78] sm:$0xff]  ;;  %v2140_v15 = vld [vmem:[%s3265_s5 + $0x68] sm:$0xff]  ;;  %v2148_v16 = vld [vmem:[%s3265_s5 + $0x60] sm:$0xff] }
  0x19   :  { %241 = vmatpush.msra.mxu1 %v2128_v13  ;;  %1774 = vmatpush.msra.mxu3 %v2128_v13  ;;  %v96_v17 = vld [vmem:[%s3260_s0 + $0x48] sm:$0xff]  ;;  %v236_v18 = vld [vmem:[%s3265_s5 + $0x58] sm:$0xff]  ;;  %v235_v19 = vld [vmem:[%s3265_s5 + $0x50] sm:$0xff] }
  0x1a   :  { %175 = vmatpush.msra.mxu0 %v103_v3  ;;  %1790 = vmatpush.msra.mxu2 %v2128_v13  ;;  %v234_v20 = vld [vmem:[%s3265_s5 + $0x48] sm:$0xff]  ;;  %v233_v21 = vld [vmem:[%s3265_s5 + $0x40] sm:$0xff]  ;;  %v97_v22 = vld [vmem:[%s3260_s0 + $0x50] sm:$0xff] }
  0x1b   :  { %1742 = vmatmul.msk.f32.vlgmr.msra.gmra.mxu0 %vm111_vm0, %v87_v4  ;;  %242 = vmatpush.msra.mxu1 %v2133_v14  ;;  %v232_v23 = vld [vmem:[%s3265_s5 + $0x38] sm:$0xff]  ;;  %v231_v24 = vld [vmem:[%s3265_s5 + $0x30] sm:$0xff]  ;;  %v230_v25 = vld [vmem:[%s3265_s5 + $0x28] sm:$0xff] }
  0x1c   :  { %1775 = vmatpush.msra.mxu3 %v2133_v14  ;;  %1791 = vmatpush.msra.mxu2 %v2133_v14  ;;  %v229_v26 = vld [vmem:[%s3265_s5 + $0x20] sm:$0xff]  ;;  %v98_v27 = vld [vmem:[%s3260_s0 + $0x58] sm:$0xff]  ;;  %v227_v29 = vld [vmem:[%s3265_s5 + $0x10] sm:$0xff] }
  0x1d   :  { %243 = vmatpush.msra.mxu1 %v2140_v15  ;;  %v228_v28 = vld [vmem:[%s3265_s5 + $0x18] sm:$0xff]  ;;  %v226_v30 = vld [vmem:[%s3265_s5 + $0x8] sm:$0xff]  ;;  %v99_v31 = vld [vmem:[%s3260_s0 + $0x60] sm:$0xff] }
  0x1e   :  { %1776 = vmatpush.msra.mxu3 %v2140_v15  ;;  %1792 = vmatpush.msra.mxu2 %v2140_v15  ;;  %v225_v32 = vld [vmem:[%s3265_s5] sm:$0xff]  ;;  %v100_v33 = vld [vmem:[%s3260_s0 + $0x68] sm:$0xff]  ;;  %v101_v34 = vld [vmem:[%s3260_s0 + $0x70] sm:$0xff] }
  0x1f   :  { %244 = vmatpush.msra.mxu1 %v2148_v16  ;;  %v102_v35 = vld [vmem:[%s3260_s0 + $0x78] sm:$0xff]  ;;  %v1813_v36 = vld [vmem:[#allocation2] ss:$0 sm:$0xff] }
  0x20   :  { %1777 = vmatpush.msra.mxu3 %v2148_v16  ;;  %1793 = vmatpush.msra.mxu2 %v2148_v16 }
  0x21   :  { %245 = vmatpush.msra.mxu1 %v236_v18 }
  0x22   :  { %1778 = vmatpush.msra.mxu3 %v236_v18  ;;  %1794 = vmatpush.msra.mxu2 %v236_v18 }
  0x23   :  { %1743 = vmatmul.msk.f32.gmra.mxu0 %vm111_vm0, %v88_v5  ;;  %246 = vmatpush.msra.mxu1 %v235_v19 }
  0x24   :  { %1779 = vmatpush.msra.mxu3 %v235_v19  ;;  %1795 = vmatpush.msra.mxu2 %v235_v19 }
  0x25   :  { %247 = vmatpush.msra.mxu1 %v234_v20 }
  0x26   :  { %1780 = vmatpush.msra.mxu3 %v234_v20  ;;  %1796 = vmatpush.msra.mxu2 %v234_v20 }
  0x27   :  { %248 = vmatpush.msra.mxu1 %v233_v21 }
  0x28   :  { %1781 = vmatpush.msra.mxu3 %v233_v21  ;;  %1797 = vmatpush.msra.mxu2 %v233_v21 }
  0x29   :  { %249 = vmatpush.msra.mxu1 %v232_v23 }
  0x2a   :  { %1782 = vmatpush.msra.mxu3 %v232_v23  ;;  %1798 = vmatpush.msra.mxu2 %v232_v23 }
  0x2b   :  { %1744 = vmatmul.msk.f32.gmra.mxu0 %vm111_vm0, %v89_v6  ;;  %250 = vmatpush.msra.mxu1 %v231_v24 }
  0x2c   :  { %1783 = vmatpush.msra.mxu3 %v231_v24  ;;  %1799 = vmatpush.msra.mxu2 %v231_v24 }
  0x2d   :  { %251 = vmatpush.msra.mxu1 %v230_v25 }
  0x2e   :  { %1784 = vmatpush.msra.mxu3 %v230_v25  ;;  %1800 = vmatpush.msra.mxu2 %v230_v25 }
  0x2f   :  { %252 = vmatpush.msra.mxu1 %v229_v26 }
  0x30   :  { %1785 = vmatpush.msra.mxu3 %v229_v26  ;;  %1801 = vmatpush.msra.mxu2 %v229_v26 }
  0x31   :  { %253 = vmatpush.msra.mxu1 %v228_v28 }
  0x32   :  { %1786 = vmatpush.msra.mxu3 %v228_v28  ;;  %1802 = vmatpush.msra.mxu2 %v228_v28 }
  0x33   :  { %1745 = vmatmul.msk.f32.gmra.mxu0 %vm111_vm0, %v90_v7  ;;  %254 = vmatpush.msra.mxu1 %v227_v29 }
  0x34   :  { %1787 = vmatpush.msra.mxu3 %v227_v29  ;;  %1803 = vmatpush.msra.mxu2 %v227_v29 }
  0x35   :  { %255 = vmatpush.msra.mxu1 %v226_v30 }
  0x36   :  { %1788 = vmatpush.msra.mxu3 %v226_v30  ;;  %1804 = vmatpush.msra.mxu2 %v226_v30 }
  0x37   :  { %256 = vmatpush.msra.mxu1 %v225_v32 }
  0x38   :  { %1789 = vmatpush.msra.mxu3 %v225_v32  ;;  %1805 = vmatpush.msra.mxu2 %v225_v32 }
  0x39   :  { %338 = vmatpush.msrb.mxu1 %v2128_v13 }
  0x3b   :  { %1746 = vmatmul.msk.f32.gmra.mxu0 %vm111_vm0, %v91_v8  ;;  %339 = vmatpush.msrb.mxu1 %v2133_v14 }
  0x3d   :  { %340 = vmatpush.msrb.mxu1 %v2140_v15 }
  0x3f   :  { %341 = vmatpush.msrb.mxu1 %v2148_v16 }
  0x41   :  { %342 = vmatpush.msrb.mxu1 %v236_v18 }
  0x43   :  { %1747 = vmatmul.msk.f32.gmra.mxu0 %vm111_vm0, %v92_v9  ;;  %343 = vmatpush.msrb.mxu1 %v235_v19 }
  0x45   :  { %344 = vmatpush.msrb.mxu1 %v234_v20 }
  0x47   :  { %345 = vmatpush.msrb.mxu1 %v233_v21 }
  0x49   :  { %346 = vmatpush.msrb.mxu1 %v232_v23 }
  0x4b   :  { %1748 = vmatmul.msk.f32.gmra.mxu0 %vm111_vm0, %v93_v10  ;;  %347 = vmatpush.msrb.mxu1 %v231_v24 }
  0x4d   :  { %348 = vmatpush.msrb.mxu1 %v230_v25 }
  0x4f   :  { %349 = vmatpush.msrb.mxu1 %v229_v26 }
  0x51   :  { %350 = vmatpush.msrb.mxu1 %v228_v28  ;;  %v1384_v28 = vld [vmem:[#allocation8 + $0x1e8] sm:$0xff] }
  0x52   :  { %1462 = vmatpush.msrb.mxu0 %v1384_v28  ;;  %v1359_v28 = vld [vmem:[#allocation8 + $0x120] sm:$0xff] }
  0x53   :  { %1749 = vmatmul.msk.f32.gmra.mxu0 %vm111_vm0, %v94_v11  ;;  %351 = vmatpush.msrb.mxu1 %v227_v29 }
  0x55   :  { %352 = vmatpush.msrb.mxu1 %v226_v30 }
  0x57   :  { %353 = vmatpush.msrb.mxu1 %v225_v32  ;;  %v1380_v32 = vld [vmem:[#allocation8 + $0x1c8] sm:$0xff] }
  0x58   :  { %1463 = vmatpush.msrb.mxu0 %v1380_v32 }
  0x5b   :  { %1750 = vmatmul.msk.f32.gmra.mxu0 %vm111_vm0, %v95_v12 }
  0x63   :  { %1751 = vmatmul.msk.f32.gmra.mxu0 %vm111_vm0, %v96_v17 }
  0x6b   :  { %1752 = vmatmul.msk.f32.gmra.mxu0 %vm111_vm0, %v97_v22 }
  0x73   :  { %1753 = vmatmul.msk.f32.gmra.mxu0 %vm111_vm0, %v98_v27 }
  0x7b   :  { %1754 = vmatmul.msk.f32.gmra.mxu0 %vm111_vm0, %v99_v31 }
  0x83   :  { %1755 = vmatmul.msk.f32.gmra.mxu0 %vm111_vm0, %v100_v33 }
  0x8b   :  { %1756 = vmatmul.msk.f32.gmra.mxu0 %vm111_vm0, %v101_v34 }
  0x93   :  { %1757 = vmatmul.msk.f32.gmra.mxu0 %vm111_vm0, %v102_v35 }
  0x98   :  { %v177_v37 = vpop.f32.mrf.mxu0 }
  0x99   :  { %v178_v38 = vadd.f32 %v1813_v36, %v177_v37 }
  0x9b   :  { %257 = vmatmul.f32.vlgmr.msra.gmra.mxu1 %v178_v38 }
  0xa0   :  { %v180_v39 = vpop.f32.mrf.mxu0 }
  0xa1   :  { %v181_v40 = vadd.f32 %v1813_v36, %v180_v39 }
  0xa3   :  { %260 = vmatmul.f32.gmra.mxu1 %v181_v40 }
  0xa8   :  { %v183_v41 = vpop.f32.mrf.mxu0 }
  0xa9   :  { %v184_v42 = vadd.f32 %v1813_v36, %v183_v41 }
  0xab   :  { %263 = vmatmul.f32.gmra.mxu1 %v184_v42 }
  0xb0   :  { %v186_v43 = vpop.f32.mrf.mxu0 }
  0xb1   :  { %v187_v44 = vadd.f32 %v1813_v36, %v186_v43  ;;  %v1386_v43 = vld [vmem:[#allocation8 + $0x1f8] sm:$0xff] }
  0xb2   :  { %1592 = vmatpush.msrb.mxu2 %v1386_v43  ;;  %v1351_v43 = vld [vmem:[#allocation8 + $0xe0] sm:$0xff] }
  0xb3   :  { %266 = vmatmul.f32.gmra.mxu1 %v187_v44 }
  0xb8   :  { %v189_v45 = vpop.f32.mrf.mxu0 }
  0xb9   :  { %v190_v46 = vadd.f32 %v1813_v36, %v189_v45 }
  0xbb   :  { %269 = vmatmul.f32.vlgmr.msra.gmra.mxu3 %v190_v46 }
  0xc0   :  { %v192_v47 = vpop.f32.mrf.mxu0 }
  0xc1   :  { %v193_v48 = vadd.f32 %v1813_v36, %v192_v47 }
  0xc3   :  { %272 = vmatmul.f32.gmra.mxu3 %v193_v48 }
  0xc8   :  { %v195_v49 = vpop.f32.mrf.mxu0 }
  0xc9   :  { %v196_v50 = vadd.f32 %v1813_v36, %v195_v49 }
  0xcb   :  { %275 = vmatmul.f32.gmra.mxu3 %v196_v50 }
  0xd0   :  { %v198_v51 = vpop.f32.mrf.mxu0 }
  0xd1   :  { %v199_v52 = vadd.f32 %v1813_v36, %v198_v51 }
  0xd3   :  { %278 = vmatmul.f32.gmra.mxu3 %v199_v52 }
  0xd8   :  { %v201_v53 = vpop.f32.mrf.mxu0 }
  0xd9   :  { %v202_v54 = vadd.f32 %v1813_v36, %v201_v53 }
  0xdb   :  { %281 = vmatmul.f32.gmra.mxu3 %v202_v54 }
  0xe0   :  { %v204_v55 = vpop.f32.mrf.mxu0 }
  0xe1   :  { %v205_v56 = vadd.f32 %v1813_v36, %v204_v55 }
  0xe3   :  { %284 = vmatmul.f32.gmra.mxu3 %v205_v56 }
  0xe8   :  { %v207_v57 = vpop.f32.mrf.mxu0 }
  0xe9   :  { %v2225_v58 = vadd.f32 %v1813_v36, %v207_v57  ;;  %v1368_v57 = vld [vmem:[#allocation8 + $0x168] sm:$0xff] }
  0xeb   :  { %287 = vmatmul.f32.gmra.mxu3 %v2225_v58 }
  0xf0   :  { %v210_v59 = vpop.f32.mrf.mxu0 }
  0xf1   :  { %v2228_v60 = vadd.f32 %v1813_v36, %v210_v59  ;;  %v1375_v59 = vld [vmem:[#allocation8 + $0x1a0] sm:$0xff] }
  0xf3   :  { %290 = vmatmul.f32.gmra.mxu3 %v2228_v60 }
  0xf8   :  { %v213_v61 = vpop.f32.mrf.mxu0 }
  0xf9   :  { %v2231_v62 = vadd.f32 %v1813_v36, %v213_v61 }
  0xfb   :  { %293 = vmatmul.f32.gmra.mxu3 %v2231_v62 }
 0x100   :  { %v216_v63 = vpop.f32.mrf.mxu0 }
 0x101   :  { %v2234_v0 = vadd.f32 %v1813_v36, %v216_v63 }
 0x103   :  { %296 = vmatmul.f32.gmra.mxu3 %v2234_v0 }
 0x108   :  { %v219_v1 = vpop.f32.mrf.mxu0 }
 0x109   :  { %v2237_v2 = vadd.f32 %v1813_v36, %v219_v1  ;;  %v1371_v1 = vld [vmem:[#allocation8 + $0x180] sm:$0xff] }
 0x10b   :  { %299 = vmatmul.f32.gmra.mxu3 %v2237_v2 }
 0x110   :  { %v222_v3 = vpop.f32.mrf.mxu0 }
 0x111   :  { %v2240_v4 = vadd.f32 %v1813_v36, %v222_v3  ;;  %v1376_v36 = vld [vmem:[#allocation8 + $0x1a8] sm:$0xff] }
 0x112   :  { %1464 = vmatpush.msrb.mxu0 %v1376_v36  ;;  %v1348_v36 = vld [vmem:[#allocation8 + $0xc8] sm:$0xff] }
 0x113   :  { %302 = vmatmul.f32.gmra.mxu3 %v2240_v4 }
 0x118   :  { %v258_v5 = vpop.f32.mrf.mxu1 }
 0x119   :  { %v2243_v6 = vsub.f32 %v178_v38, %v258_v5 }
 0x11b   :  { %v322_v7 = vmul.f32 %v2243_v6, %v2243_v6 }
 0x11d   :  { %354 = vmatmul.f32.vlgmr.msrb.gmra.mxu1 %v322_v7  ;;  %v1360_v7 = vld [vmem:[#allocation8 + $0x128] sm:$0xff] }
 0x120   :  { %v261_v8 = vpop.f32.mrf.mxu1 }
 0x121   :  { %v2247_v9 = vsub.f32 %v181_v40, %v261_v8  ;;  %v1372_v40 = vld [vmem:[#allocation8 + $0x188] sm:$0xff]  ;;  %v1367_v8 = vld [vmem:[#allocation8 + $0x160] sm:$0xff] }
 0x122   :  { %1465 = vmatpush.msrb.mxu0 %v1372_v40 }
 0x123   :  { %v323_v10 = vmul.f32 %v2247_v9, %v2247_v9 }
 0x124   :  { %1466 = vmatpush.msrb.mxu0 %v1368_v57 }
 0x125   :  { %357 = vmatmul.f32.gmra.mxu1 %v323_v10  ;;  %v1370_v10 = vld [vmem:[#allocation8 + $0x178] sm:$0xff] }
 0x128   :  { %v264_v11 = vpop.f32.mrf.mxu1 }
 0x129   :  { %v2251_v12 = vsub.f32 %v184_v42, %v264_v11  ;;  %v1383_v42 = vld [vmem:[#allocation8 + $0x1e0] sm:$0xff] }
 0x12a   :  { %1397 = vmatpush.msrb.mxu3 %v1383_v42  ;;  %v1381_v42 = vld [vmem:[#allocation8 + $0x1d0] sm:$0xff] }
 0x12b   :  { %v324_v13 = vmul.f32 %v2251_v12, %v2251_v12 }
 0x12d   :  { %360 = vmatmul.f32.gmra.mxu1 %v324_v13 }
 0x130   :  { %v267_v14 = vpop.f32.mrf.mxu1 }
 0x131   :  { %v2255_v15 = vsub.f32 %v187_v44, %v267_v14 }
 0x133   :  { %v325_v16 = vmul.f32 %v2255_v15, %v2255_v15 }
 0x135   :  { %363 = vmatmul.f32.gmra.mxu1 %v325_v16 }
 0x13e   :  { %v270_v17 = vpop.f32.mrf.mxu3 }
 0x13f   :  { %v2259_v18 = vsub.f32 %v190_v46, %v270_v17 }
 0x141   :  { %v326_v19 = vmul.f32 %v2259_v18, %v2259_v18 }
 0x143   :  { %366 = vmatmul.f32.vlgmr.msra.gmra.mxu2 %v326_v19  ;;  %v1385_v19 = vld [vmem:[#allocation8 + $0x1f0] sm:$0xff] }
 0x144   :  { %1527 = vmatpush.msra.mxu1 %v1385_v19  ;;  %v1347_v19 = vld [vmem:[#allocation8 + $0xc0] sm:$0xff] }
 0x146   :  { %v273_v20 = vpop.f32.mrf.mxu3  ;;  %1528 = vmatpush.msra.mxu1 %v1381_v42 }
 0x147   :  { %v2263_v21 = vsub.f32 %v193_v48, %v273_v20  ;;  %v1363_v20 = vld [vmem:[#allocation8 + $0x140] sm:$0xff] }
 0x149   :  { %v327_v22 = vmul.f32 %v2263_v21, %v2263_v21 }
 0x14b   :  { %369 = vmatmul.f32.gmra.mxu2 %v327_v22  ;;  %v1356_v22 = vld [vmem:[#allocation8 + $0x108] sm:$0xff] }
 0x14e   :  { %v276_v23 = vpop.f32.mrf.mxu3 }
 0x14f   :  { %v2267_v24 = vsub.f32 %v196_v50, %v276_v23  ;;  %v1366_v23 = vld [vmem:[#allocation8 + $0x158] sm:$0xff] }
 0x151   :  { %v328_v25 = vmul.f32 %v2267_v24, %v2267_v24 }
 0x153   :  { %372 = vmatmul.f32.gmra.mxu2 %v328_v25 }
 0x156   :  { %v279_v26 = vpop.f32.mrf.mxu3 }
 0x157   :  { %v2271_v27 = vsub.f32 %v199_v52, %v279_v26 }
 0x159   :  { %v329_v29 = vmul.f32 %v2271_v27, %v2271_v27 }
 0x15b   :  { %375 = vmatmul.f32.gmra.mxu2 %v329_v29  ;;  %v1362_v29 = vld [vmem:[#allocation8 + $0x138] sm:$0xff] }
 0x15e   :  { %v282_v30 = vpop.f32.mrf.mxu3 }
 0x15f   :  { %v2275_v31 = vsub.f32 %v202_v54, %v282_v30  ;;  %v1352_v30 = vld [vmem:[#allocation8 + $0xe8] sm:$0xff] }
 0x161   :  { %v330_v33 = vmul.f32 %v2275_v31, %v2275_v31 }
 0x163   :  { %378 = vmatmul.f32.gmra.mxu2 %v330_v33 }
 0x166   :  { %v285_v34 = vpop.f32.mrf.mxu3 }
 0x167   :  { %v2279_v35 = vsub.f32 %v205_v56, %v285_v34  ;;  %v1379_v56 = vld [vmem:[#allocation8 + $0x1c0] sm:$0xff] }
 0x168   :  { %1398 = vmatpush.msrb.mxu3 %v1379_v56  ;;  %v1355_v34 = vld [vmem:[#allocation8 + $0x100] sm:$0xff]  ;;  %v1369_v56 = vld [vmem:[#allocation8 + $0x170] sm:$0xff] }
 0x169   :  { %v331_v37 = vmul.f32 %v2279_v35, %v2279_v35 }
 0x16a   :  { %1399 = vmatpush.msrb.mxu3 %v1375_v59 }
 0x16b   :  { %381 = vmatmul.f32.gmra.mxu2 %v331_v37 }
 0x16c   :  { %1400 = vmatpush.msrb.mxu3 %v1371_v1 }
 0x16e   :  { %v288_v38 = vpop.f32.mrf.mxu3  ;;  %1401 = vmatpush.msrb.mxu3 %v1367_v8  ;;  %v1357_v8 = vld [vmem:[#allocation8 + $0x110] sm:$0xff] }
 0x16f   :  { %v2284_v39 = vsub.f32 %v2225_v58, %v288_v38  ;;  %v1382_v58 = vld [vmem:[#allocation8 + $0x1d8] sm:$0xff] }
 0x170   :  { %1593 = vmatpush.msrb.mxu2 %v1382_v58  ;;  %1402 = vmatpush.msrb.mxu3 %v1363_v20  ;;  %v2318_v38 = vld [vmem:[#allocation5] ss:$0 sm:$0xff] }
 0x171   :  { %v332_v41 = vmul.f32 %v2284_v39, %v2284_v39  ;;  %v1350_v20 = vld [vmem:[#allocation8 + $0xd8] sm:$0xff] }
 0x172   :  { %1403 = vmatpush.msrb.mxu3 %v1359_v28 }
 0x173   :  { %384 = vmatmul.f32.gmra.mxu2 %v332_v41  ;;  %v1358_v41 = vld [vmem:[#allocation8 + $0x118] sm:$0xff] }
 0x174   :  { %1404 = vmatpush.msrb.mxu3 %v1355_v34  ;;  %v1346_v34 = vld [vmem:[#allocation8 + $0xb8] sm:$0xff] }
 0x176   :  { %v291_v44 = vpop.f32.mrf.mxu3  ;;  %1405 = vmatpush.msrb.mxu3 %v1351_v43  ;;  %v1340_v43 = vld [vmem:[#allocation8 + $0x88] sm:$0xff] }
 0x177   :  { %v2289_v45 = vsub.f32 %v2228_v60, %v291_v44  ;;  %v1378_v60 = vld [vmem:[#allocation8 + $0x1b8] sm:$0xff]  ;;  %v1377_v44 = vld [vmem:[#allocation8 + $0x1b0] sm:$0xff] }
 0x178   :  { %1594 = vmatpush.msrb.mxu2 %v1378_v60  ;;  %1529 = vmatpush.msra.mxu1 %v1377_v44  ;;  %v1365_v60 = vld [vmem:[#allocation8 + $0x150] sm:$0xff]  ;;  %v1342_v44 = vld [vmem:[#allocation8 + $0x98] sm:$0xff] }
 0x179   :  { %v333_v46 = vmul.f32 %v2289_v45, %v2289_v45  ;;  %1406 = vmatpush.msrb.mxu3 %v1347_v19 }
 0x17b   :  { %387 = vmatmul.f32.gmra.mxu2 %v333_v46 }
 0x17e   :  { %v294_v47 = vpop.f32.mrf.mxu3 }
 0x17f   :  { %v2294_v48 = vsub.f32 %v2231_v62, %v294_v47 }
 0x181   :  { %v334_v49 = vmul.f32 %v2294_v48, %v2294_v48 }
 0x183   :  { %390 = vmatmul.f32.gmra.mxu2 %v334_v49  ;;  %v1354_v49 = vld [vmem:[#allocation8 + $0xf8] sm:$0xff] }
 0x186   :  { %v297_v50 = vpop.f32.mrf.mxu3 }
 0x187   :  { %v2299_v51 = vsub.f32 %v2234_v0, %v297_v50  ;;  %v1364_v0 = vld [vmem:[#allocation8 + $0x148] sm:$0xff]  ;;  %v1373_v50 = vld [vmem:[#allocation8 + $0x190] sm:$0xff] }
 0x188   :  { %1467 = vmatpush.msrb.mxu0 %v1364_v0  ;;  %1530 = vmatpush.msra.mxu1 %v1373_v50 }
 0x189   :  { %v335_v52 = vmul.f32 %v2299_v51, %v2299_v51 }
 0x18a   :  { %1468 = vmatpush.msrb.mxu0 %v1360_v7  ;;  %1531 = vmatpush.msra.mxu1 %v1369_v56  ;;  %v1336_v56 = vld [vmem:[#allocation8 + $0x68] sm:$0xff] }
 0x18b   :  { %393 = vmatmul.f32.gmra.mxu2 %v335_v52 }
 0x18c   :  { %1469 = vmatpush.msrb.mxu0 %v1356_v22  ;;  %1532 = vmatpush.msra.mxu1 %v1365_v60 }
 0x18e   :  { %v300_v53 = vpop.f32.mrf.mxu3  ;;  %1470 = vmatpush.msrb.mxu0 %v1352_v30  ;;  %v1344_v30 = vld [vmem:[#allocation8 + $0xa8] sm:$0xff] }
 0x18f   :  { %v2304_v54 = vsub.f32 %v2237_v2, %v300_v53  ;;  %v1374_v2 = vld [vmem:[#allocation8 + $0x198] sm:$0xff] }
 0x190   :  { %1595 = vmatpush.msrb.mxu2 %v1374_v2  ;;  %1471 = vmatpush.msrb.mxu0 %v1348_v36  ;;  %v2324_v53 = vld [vmem:[#allocation7] ss:$0 sm:$0xff]  ;;  %v1361_v2 = vld [vmem:[#allocation8 + $0x130] sm:$0xff] }
 0x191   :  { %v336_v55 = vmul.f32 %v2304_v54, %v2304_v54  ;;  %1533 = vmatpush.msra.mxu1 %v1361_v2  ;;  %v1345_v36 = vld [vmem:[#allocation8 + $0xb0] sm:$0xff]  ;;  %v1331_v2 = vld [vmem:[#allocation8 + $0x40] sm:$0xff] }
 0x192   :  { %1596 = vmatpush.msrb.mxu2 %v1370_v10  ;;  %1472 = vmatpush.msrb.mxu0 %v1344_v30  ;;  %v1324_v30 = vld [vmem:[#allocation8 + $0x8] sm:$0xff] }
 0x193   :  { %396 = vmatmul.f32.gmra.mxu2 %v336_v55  ;;  %1534 = vmatpush.msra.mxu1 %v1357_v8 }
 0x194   :  { %1597 = vmatpush.msrb.mxu2 %v1366_v23  ;;  %1473 = vmatpush.msrb.mxu0 %v1340_v43 }
 0x196   :  { %v303_v61 = vpop.f32.mrf.mxu3  ;;  %1598 = vmatpush.msrb.mxu2 %v1362_v29  ;;  %1474 = vmatpush.msrb.mxu0 %v1336_v56 }
 0x197   :  { %v2309_v62 = vsub.f32 %v2240_v4, %v303_v61 }
 0x198   :  { %1599 = vmatpush.msrb.mxu2 %v1358_v41 }
 0x199   :  { %v337_v63 = vmul.f32 %v2309_v62, %v2309_v62 }
 0x19a   :  { %v355_v3 = vpop.f32.mrf.mxu1  ;;  %1600 = vmatpush.msrb.mxu2 %v1354_v49  ;;  %v1341_v49 = vld [vmem:[#allocation8 + $0x90] sm:$0xff] }
 0x19b   :  { %v356_v5 = vadd.f32 1e-06, %v355_v3  ;;  %399 = vmatmul.f32.gmra.mxu2 %v337_v63 }
 0x19c   :  { %1601 = vmatpush.msrb.mxu2 %v1350_v20 }
 0x19d   :  { %1816 = vrsqrt.f32 %v356_v5  ;;  %vm409_vm2 = vweird.f32 %v356_v5 }
 0x19e   :  { %1602 = vmatpush.msrb.mxu2 %v1346_v34 }
 0x1a0   :  { %1603 = vmatpush.msrb.mxu2 %v1342_v44 }
 0x1a2   :  { %v358_v11 = vpop.f32.mrf.mxu1 }
 0x1a3   :  { %v1817_v4 = vpop.eup %1816  ;;  %v2313_v13 = vadd.f32 1e-06, %v358_v11 }
 0x1a4   :  { %v404_v14 = vmul.f32 %v1817_v4, %v356_v5  ;;  %vm410_vm1 = vweird.f32 %v1817_v4 }
 0x1a5   :  { %1818 = vrsqrt.f32 %v2313_v13  ;;  %vm411_vm3 = vmor %vm409_vm2, %vm410_vm1  ;;  %vm419_vm5 = vweird.f32 %v2313_v13 }
 0x1a6   :  { %v405_v16 = vmul.f32 %v1817_v4, %v404_v14  ;;  %v1353_v14 = vld [vmem:[#allocation8 + $0xf0] sm:$0xff] }
 0x1a7   :  { %1535 = vmatpush.msra.mxu1 %v1353_v14  ;;  %v1327_v14 = vld [vmem:[#allocation8 + $0x20] sm:$0xff] }
 0x1a8   :  { %v406_v17 = vmul.f32 0.5, %v405_v16 }
 0x1aa   :  { %v407_v25 = vsub.f32 1.5, %v406_v17  ;;  %v361_v26 = vpop.f32.mrf.mxu1 }
 0x1ab   :  { %v1819_v32 = vpop.eup %1818  ;;  %v2316_v33 = vadd.f32 1e-06, %v361_v26 }
 0x1ac   :  { %v408_v37 = vmul.f32 %v1817_v4, %v407_v25  ;;  %v414_v40 = vmul.f32 %v1819_v32, %v2313_v13  ;;  %vm420_vm4 = vweird.f32 %v1819_v32 }
 0x1ad   :  { %1820 = vrsqrt.f32 %v2316_v33  ;;  %vm421_vm6 = vmor %vm419_vm5, %vm420_vm4  ;;  %vm429_vm8 = vweird.f32 %v2316_v33 }
 0x1ae   :  { %v412_v46 = vsel %vm411_vm3, %v1817_v4, %v408_v37  ;;  %v415_v47 = vmul.f32 %v1819_v32, %v414_v40 }
 0x1af   :  { %v563_v52 = vmul.f32 %v412_v46, %v2243_v6 }
 0x1b0   :  { %v416_v55 = vmul.f32 0.5, %v415_v47 }
 0x1b1   :  { %v583_v57 = vmul.f32 %v2318_v38, %v563_v52 }
 0x1b2   :  { %v417_v58 = vsub.f32 1.5, %v416_v55  ;;  %v364_v59 = vpop.f32.mrf.mxu1 }
 0x1b3   :  { %v1821_v61 = vpop.eup %1820  ;;  %v2327_v63 = vadd.f32 1e-06, %v364_v59  ;;  %v2330_v6 = vadd.f32 %v2324_v53, %v583_v57  ;;  %v1335_v57 = vld [vmem:[#allocation8 + $0x60] sm:$0xff] }
 0x1b4   :  { %v418_v0 = vmul.f32 %v1819_v32, %v417_v58  ;;  %v424_v1 = vmul.f32 %v1821_v61, %v2316_v33  ;;  %vm430_vm7 = vweird.f32 %v1821_v61  ;;  %v1339_v33 = vld [vmem:[#allocation8 + $0x80] sm:$0xff]  ;;  %v1338_v58 = vld [vmem:[#allocation8 + $0x78] sm:$0xff] }
 0x1b5   :  { %1822 = vrsqrt.f32 %v2327_v63  ;;  %v2336_v3 = vmul.f32 0.70710677, %v2330_v6  ;;  %vm431_vm9 = vmor %vm429_vm8, %vm430_vm7  ;;  %1604 = vmatpush.msrb.mxu2 %v1338_v58  ;;  %vm439_vm11 = vweird.f32 %v2327_v63 }
 0x1b6   :  { %v422_v5 = vsel %vm421_vm6, %v1819_v32, %v418_v0  ;;  %v425_v7 = vmul.f32 %v1821_v61, %v424_v1  ;;  %v1343_v32 = vld [vmem:[#allocation8 + $0xa0] sm:$0xff] }
 0x1b7   :  { %v564_v10 = vmul.f32 %v422_v5, %v2247_v9  ;;  %v651_v11 = vmul.f32 %v2336_v3, %v2336_v3  ;;  %v1349_v9 = vld [vmem:[#allocation8 + $0xd0] sm:$0xff]  ;;  %1407 = vmatpush.msrb.mxu3 %v1343_v32  ;;  %v1332_v5 = vld [vmem:[#allocation8 + $0x48] sm:$0xff] }
 0x1b8   :  { %v426_v4 = vmul.f32 0.5, %v425_v7  ;;  %1536 = vmatpush.msra.mxu1 %v1349_v9  ;;  %v1334_v7 = vld [vmem:[#allocation8 + $0x58] sm:$0xff]  ;;  %1475 = vmatpush.msrb.mxu0 %v1332_v5  ;;  %v1329_v9 = vld [vmem:[#allocation8 + $0x30] sm:$0xff] }
 0x1b9   :  { %v584_v13 = vmul.f32 %v2318_v38, %v564_v10  ;;  %v2342_v16 = vmin.f32 %v651_v11, 16.0  ;;  %1408 = vmatpush.msrb.mxu3 %v1339_v33  ;;  %v1333_v10 = vld [vmem:[#allocation8 + $0x50] sm:$0xff]  ;;  %1605 = vmatpush.msrb.mxu2 %v1334_v7 }
 0x1ba   :  { %v427_v17 = vsub.f32 1.5, %v426_v4  ;;  %1537 = vmatpush.msra.mxu1 %v1345_v36 }
 0x1bb   :  { %v2344_v22 = vpop.eup %1822  ;;  %v653_v23 = vmul.f32 2.1237322e-06, %v2342_v16  ;;  %v664_v25 = vmul.f32 3.8918573e-05, %v2342_v16  ;;  %v2349_v26 = vadd.f32 %v2324_v53, %v584_v13  ;;  %1409 = vmatpush.msrb.mxu3 %v1335_v57 }
 0x1bc   :  { %v428_v28 = vmul.f32 %v1821_v61, %v427_v17  ;;  %v434_v29 = vmul.f32 %v2344_v22, %v2327_v63  ;;  %vm440_vm10 = vweird.f32 %v2344_v22  ;;  %1538 = vmatpush.msra.mxu1 %v1341_v49  ;;  %v1328_v17 = vld [vmem:[#allocation8 + $0x28] sm:$0xff] }
 0x1bd   :  { %v654_v37 = vadd.f32 0.00028619796, %v653_v23  ;;  %v665_v40 = vadd.f32 0.001143296, %v664_v25  ;;  %v2357_v46 = vmul.f32 0.70710677, %v2349_v26  ;;  %1410 = vmatpush.msrb.mxu3 %v1331_v2  ;;  %vm441_vm12 = vmor %vm439_vm11, %vm440_vm10  ;;  %1476 = vmatpush.msrb.mxu0 %v1328_v17 }
 0x1be   :  { %v432_v41 = vsel %vm431_vm9, %v1821_v61, %v428_v28  ;;  %v435_v42 = vmul.f32 %v2344_v22, %v434_v29  ;;  %v1330_v23 = vld [vmem:[#allocation8 + $0x38] sm:$0xff]  ;;  %v1323_v29 = vld [vmem:[#allocation8] sm:$0xff] }
 0x1bf   :  { %v565_v47 = vmul.f32 %v432_v41, %v2251_v12  ;;  %v655_v50 = vmul.f32 %v654_v37, %v2342_v16  ;;  %v666_v52 = vmul.f32 %v665_v40, %v2342_v16  ;;  %v691_v59 = vmul.f32 %v2357_v46, %v2357_v46  ;;  %v1337_v12 = vld [vmem:[#allocation8 + $0x70] sm:$0xff]  ;;  %1411 = vmatpush.msrb.mxu3 %v1327_v14  ;;  %v1326_v41 = vld [vmem:[#allocation8 + $0x18] sm:$0xff] }
 0x1c0   :  { %v436_v55 = vmul.f32 0.5, %v435_v42  ;;  %1539 = vmatpush.msra.mxu1 %v1337_v12  ;;  %1606 = vmatpush.msrb.mxu2 %v1330_v23  ;;  %v1325_v40 = vld [vmem:[#allocation8 + $0x10] sm:$0xff] }
 0x1c1   :  { %v585_v60 = vmul.f32 %v2318_v38, %v565_v47  ;;  %v656_v61 = vadd.f32 0.0036580483, %v655_v50  ;;  %v667_v0 = vadd.f32 0.014752088, %v666_v52  ;;  %v2366_v8 = vmin.f32 %v691_v59, 16.0  ;;  %1412 = vmatpush.msrb.mxu3 %v1323_v29  ;;  %1477 = vmatpush.msrb.mxu0 %v1324_v30 }
 0x1c2   :  { %v437_v1 = vsub.f32 1.5, %v436_v55  ;;  %1540 = vmatpush.msra.mxu1 %v1333_v10  ;;  %1607 = vmatpush.msrb.mxu2 %v1326_v41 }
 0x1c3   :  { %v657_v11 = vmul.f32 %v656_v61, %v2342_v16  ;;  %v668_v4 = vmul.f32 %v667_v0, %v2342_v16  ;;  %v693_v19 = vmul.f32 2.1237322e-06, %v2366_v8  ;;  %v2374_v20 = vadd.f32 %v2324_v53, %v585_v60 }
 0x1c4   :  { %v438_v13 = vmul.f32 %v2344_v22, %v437_v1  ;;  %1541 = vmatpush.msra.mxu1 %v1329_v9  ;;  %v704_v43 = vmul.f32 3.8918573e-05, %v2366_v8 }
 0x1c5   :  { %v669_v25 = vadd.f32 0.112945676, %v668_v4  ;;  %v658_v32 = vadd.f32 0.05243302, %v657_v11  ;;  %v694_v34 = vadd.f32 0.00028619796, %v693_v19 }
 0x1c6   :  { %v442_v28 = vsel %vm441_vm12, %v2344_v22, %v438_v13  ;;  %v367_v63 = vpop.f32.mrf.mxu2  ;;  %v2386_v33 = vmul.f32 0.70710677, %v2374_v20  ;;  %1542 = vmatpush.msra.mxu1 %v1325_v40  ;;  %v705_v49 = vadd.f32 0.001143296, %v704_v43 }
 0x1c7   :  { %v566_v36 = vmul.f32 %v442_v28, %v2255_v15  ;;  %v2380_v37 = vadd.f32 1e-06, %v367_v63  ;;  %v670_v42 = vmul.f32 %v669_v25, %v2342_v16  ;;  %v695_v22 = vmul.f32 %v694_v34, %v2366_v8 }
 0x1c8   :  { %v659_v15 = vmul.f32 %v658_v32, %v2342_v16  ;;  %v731_v50 = vmul.f32 %v2386_v33, %v2386_v33  ;;  %v706_v56 = vmul.f32 %v705_v49, %v2366_v8 }
 0x1c9   :  { %v586_v44 = vmul.f32 %v2318_v38, %v566_v36  ;;  %1824 = vrsqrt.f32 %v2380_v37  ;;  %v671_v47 = vadd.f32 0.4994258, %v670_v42  ;;  %v696_v52 = vadd.f32 0.0036580483, %v695_v22 }
 0x1ca   :  { %v2395_v57 = vmin.f32 %v731_v50, 16.0  ;;  %v660_v60 = vadd.f32 0.18741608, %v659_v15  ;;  %v707_v61 = vadd.f32 0.014752088, %v706_v56  ;;  %vm449_vm2 = vweird.f32 %v2380_v37 }
 0x1cb   :  { %v672_v55 = vmul.f32 %v671_v47, %v2342_v16  ;;  %v2398_v58 = vadd.f32 %v2324_v53, %v586_v44  ;;  %v697_v10 = vmul.f32 %v696_v52, %v2366_v8 }
 0x1cc   :  { %v733_v2 = vmul.f32 2.1237322e-06, %v2395_v57  ;;  %v744_v5 = vmul.f32 3.8918573e-05, %v2395_v57  ;;  %v708_v13 = vmul.f32 %v707_v61, %v2366_v8  ;;  %v661_v19 = vmul.f32 %v660_v60, %v2342_v16 }
 0x1cd   :  { %v673_v12 = vadd.f32 1.0, %v672_v55  ;;  %v2410_v11 = vmul.f32 0.70710677, %v2398_v58  ;;  %v698_v9 = vadd.f32 0.05243302, %v697_v10 }
 0x1ce   :  { %v370_v59 = vpop.f32.mrf.mxu2  ;;  %v734_v14 = vadd.f32 0.00028619796, %v733_v2  ;;  %v745_v17 = vadd.f32 0.001143296, %v744_v5  ;;  %v709_v23 = vadd.f32 0.112945676, %v708_v13 }
 0x1cf   :  { %v2400_v0 = vpop.eup %1824  ;;  %v2402_v1 = vadd.f32 1e-06, %v370_v59  ;;  %1826 = vrcp.f32 %v673_v12  ;;  %v771_v25 = vmul.f32 %v2410_v11, %v2410_v11  ;;  %v662_v22 = vadd.f32 1.1283791, %v661_v19 }
 0x1d0   :  { %v444_v7 = vmul.f32 %v2400_v0, %v2380_v37  ;;  %v746_v28 = vmul.f32 %v745_v17, %v2395_v57  ;;  %v710_v32 = vmul.f32 %v709_v23, %v2366_v8  ;;  %v735_v34 = vmul.f32 %v734_v14, %v2395_v57 }
 0x1d1   :  { %1828 = vrsqrt.f32 %v2402_v1  ;;  %v699_v43 = vmul.f32 %v698_v9, %v2366_v8  ;;  %v2428_v44 = vmin.f32 %v771_v25, 16.0  ;;  %v683_v47 = vand.u32 2147483647, %v673_v12 }
 0x1d2   :  { %v445_v4 = vmul.f32 %v2400_v0, %v444_v7  ;;  %v747_v16 = vadd.f32 0.014752088, %v746_v28  ;;  %v711_v49 = vadd.f32 0.4994258, %v710_v32  ;;  %v685_v55 = vand.u32 2147483648, %v673_v12 }
 0x1d3   :  { %v736_v56 = vadd.f32 0.0036580483, %v735_v34  ;;  %vm450_vm14 = vweird.f32 %v2400_v0  ;;  %v663_v2 = vmul.f32 %v662_v22, %v2336_v3  ;;  %v700_v5 = vadd.f32 0.18741608, %v699_v43 }
 0x1d4   :  { %v446_v29 = vmul.f32 0.5, %v445_v4  ;;  %v712_v60 = vmul.f32 %v711_v49, %v2366_v8  ;;  %v748_v61 = vmul.f32 %v747_v16, %v2395_v57  ;;  %v773_v7 = vmul.f32 2.1237322e-06, %v2428_v44  ;;  %vm2453_vm3 = vmor %vm449_vm2, %vm450_vm14 }
 0x1d5   :  { %v1827_v63 = vpop.eup %1826  ;;  %vm679_vm15 = vweird.f32 %v673_v12  ;;  %vm684_vm0 = vcmp.eq.f32.partialorder %v683_v47, 8.507059e+37  ;;  %v686_v19 = vor.u32 1.1754944e-38, %v685_v55  ;;  %v737_v9 = vmul.f32 %v736_v56, %v2395_v57 }
 0x1d6   :  { %v373_v30 = vpop.f32.mrf.mxu2  ;;  %v675_v41 = vmul.f32 %v1827_v63, %v673_v12  ;;  %v447_v50 = vsub.f32 1.5, %v446_v29  ;;  %vm680_vm13 = vweird.f32 %v1827_v63  ;;  %v2437_v4 = vadd.f32 1.0, %v712_v60 }
 0x1d7   :  { %v2421_v36 = vpop.eup %1828  ;;  %v2423_v40 = vadd.f32 1e-06, %v373_v30  ;;  %vm681_vm1 = vmor %vm679_vm15, %vm680_vm13  ;;  %v749_v28 = vadd.f32 0.112945676, %v748_v61  ;;  %v701_v30 = vmul.f32 %v700_v5, %v2366_v8  ;;  %v774_v32 = vadd.f32 0.00028619796, %v773_v7 }
 0x1d8   :  { %v454_v42 = vmul.f32 %v2421_v36, %v2402_v1  ;;  %v676_v15 = vsub.f32 1.0, %v675_v41  ;;  %v448_v13 = vmul.f32 %v2400_v0, %v447_v50  ;;  %v738_v16 = vadd.f32 0.05243302, %v737_v9 }
 0x1d9   :  { %1830 = vrsqrt.f32 %v2423_v40  ;;  %v750_v37 = vmul.f32 %v749_v28, %v2395_v57  ;;  %v619_v43 = vmul.f32 0.5, %v2330_v6  ;;  %v702_v47 = vadd.f32 1.1283791, %v701_v30 }
 0x1da   :  { %v455_v52 = vmul.f32 %v2421_v36, %v454_v42  ;;  %v677_v59 = vmul.f32 %v1827_v63, %v676_v15  ;;  %1832 = vrcp.f32 %v2437_v4  ;;  %v452_v42 = vsel %vm2453_vm3, %v2400_v0, %v448_v13 }
 0x1db   :  { %v2464_v15 = vmul.f32 0.5, %v2349_v26  ;;  %v775_v49 = vmul.f32 %v774_v32, %v2428_v44  ;;  %vm460_vm4 = vweird.f32 %v2421_v36  ;;  %v751_v55 = vadd.f32 0.4994258, %v750_v37 }
 0x1dc   :  { %v678_v10 = vadd.f32 %v1827_v63, %v677_v59  ;;  %v456_v14 = vmul.f32 0.5, %v455_v52  ;;  %v784_v56 = vmul.f32 3.8918573e-05, %v2428_v44  ;;  %v567_v0 = vmul.f32 %v452_v42, %v2259_v18 }
 0x1dd   :  { %v739_v6 = vmul.f32 %v738_v16, %v2395_v57  ;;  %v723_v18 = vand.u32 2147483647, %v2437_v4  ;;  %vm459_vm6 = vweird.f32 %v2402_v1  ;;  %v703_v32 = vmul.f32 %v702_v47, %v2357_v46 }
 0x1de   :  { %v376_v17 = vpop.f32.mrf.mxu2  ;;  %v682_v3 = vsel %vm681_vm1, %v1827_v63, %v678_v10  ;;  %v457_v8 = vsub.f32 1.5, %v456_v14  ;;  %v752_v10 = vmul.f32 %v751_v55, %v2395_v57  ;;  %vm2492_vm7 = vmor %vm459_vm6, %vm460_vm4  ;;  %vm719_vm8 = vweird.f32 %v2437_v4 }
 0x1df   :  { %v2441_v23 = vpop.eup %1830  ;;  %v2443_v25 = vadd.f32 1e-06, %v376_v17  ;;  %v687_v29 = vsel %vm684_vm0, %v686_v19, %v682_v3  ;;  %v776_v17 = vadd.f32 0.0036580483, %v775_v49  ;;  %v725_v19 = vand.u32 2147483648, %v2437_v4 }
 0x1e0   :  { %v464_v12 = vmul.f32 %v2441_v23, %v2423_v40  ;;  %v688_v34 = vmul.f32 %v687_v29, %v663_v2  ;;  %v1833_v50 = vpop.eup %1832  ;;  %v458_v2 = vmul.f32 %v2421_v36, %v457_v8  ;;  %v2483_v9 = vadd.f32 1.0, %v752_v10 }
 0x1e1   :  { %1834 = vrsqrt.f32 %v2443_v25  ;;  %v715_v61 = vmul.f32 %v1833_v50, %v2437_v4  ;;  %v785_v3 = vadd.f32 0.001143296, %v784_v56  ;;  %vm720_vm5 = vweird.f32 %v1833_v50 }
 0x1e2   :  { %v465_v63 = vmul.f32 %v2441_v23, %v464_v12  ;;  %v1758_v22 = vclamps-f32 %v688_v34, 1.0  ;;  %v740_v29 = vadd.f32 0.18741608, %v739_v6  ;;  %v587_v34 = vmul.f32 %v2318_v38, %v567_v0  ;;  %vm721_vm10 = vmor %vm719_vm8, %vm720_vm5 }
 0x1e3   :  { %v716_v14 = vsub.f32 1.0, %v715_v61  ;;  %v777_v16 = vmul.f32 %v776_v17, %v2428_v44  ;;  %v462_v1 = vsel %vm2492_vm7, %v2421_v36, %v458_v2  ;;  %vm470_vm9 = vweird.f32 %v2441_v23 }
 0x1e4   :  { %v1291_v52 = vadd.f32 1.0, %v1758_v22  ;;  %v466_v59 = vmul.f32 0.5, %v465_v63  ;;  %v726_v46 = vor.u32 1.1754944e-38, %v725_v19  ;;  %v786_v42 = vmul.f32 %v785_v3, %v2428_v44 }
 0x1e5   :  { %v717_v12 = vmul.f32 %v1833_v50, %v716_v14  ;;  %vm724_vm11 = vcmp.eq.f32.partialorder %v723_v18, 8.507059e+37  ;;  %vm469_vm12 = vweird.f32 %v2423_v40  ;;  %v778_v56 = vadd.f32 0.05243302, %v777_v16 }
 0x1e6   :  { %v379_v60 = vpop.f32.mrf.mxu2  ;;  %v1307_v7 = vmul.f32 %v1291_v52, %v619_v43  ;;  %v467_v28 = vsub.f32 1.5, %v466_v59  ;;  %v741_v43 = vmul.f32 %v740_v29, %v2395_v57  ;;  %v787_v36 = vadd.f32 0.014752088, %v786_v42  ;;  %vm2521_vm14 = vmor %vm469_vm12, %vm470_vm9 }
 0x1e7   :  { %v2472_v26 = vpop.eup %1834  ;;  %v2475_v5 = vadd.f32 1e-06, %v379_v60  ;;  %v718_v63 = vadd.f32 %v1833_v50, %v717_v12  ;;  %v2511_v0 = vadd.f32 %v2324_v53, %v587_v34  ;;  %vm479_vm13 = vweird.f32 %v2443_v25 }
 0x1e8   :  { %v474_v13 = vmul.f32 %v2472_v26, %v2443_v25  ;;  %1413 = vmatmul.f32.vlgmr.msrb.gmra.mxu3 %v1307_v7  ;;  %1478 = vmatmul.f32.vlgmr.msrb.gmra.mxu0 %v1307_v7  ;;  %v468_v8 = vmul.f32 %v2441_v23, %v467_v28  ;;  %v568_v60 = vmul.f32 %v462_v1, %v2263_v21  ;;  %v742_v6 = vadd.f32 1.1283791, %v741_v43 }
 0x1e9   :  { %1836 = vrsqrt.f32 %v2475_v5  ;;  %1543 = vmatmul.f32.vlgmr.msra.gmra.mxu1 %v1307_v7  ;;  %1608 = vmatmul.f32.vlgmr.msrb.gmra.mxu2 %v1307_v7  ;;  %v722_v37 = vsel %vm721_vm10, %v1833_v50, %v718_v63  ;;  %v788_v50 = vmul.f32 %v787_v36, %v2428_v44  ;;  %vm480_vm15 = vweird.f32 %v2472_v26 }
 0x1ea   :  { %v475_v30 = vmul.f32 %v2472_v26, %v474_v13  ;;  %1838 = vrcp.f32 %v2483_v9  ;;  %v727_v52 = vsel %vm724_vm11, %v726_v46, %v722_v37  ;;  %v472_v7 = vsel %vm2521_vm14, %v2441_v23, %v468_v8  ;;  %vm2556_vm3 = vmor %vm479_vm13, %vm480_vm15 }
 0x1eb   :  { %v728_v55 = vmul.f32 %v727_v52, %v703_v32  ;;  %v789_v13 = vadd.f32 0.112945676, %v788_v50  ;;  %v779_v18 = vmul.f32 %v778_v56, %v2428_v44  ;;  %v2532_v17 = vmul.f32 0.70710677, %v2511_v0 }
 0x1ec   :  { %v476_v47 = vmul.f32 0.5, %v475_v30  ;;  %v763_v3 = vand.u32 2147483647, %v2483_v9  ;;  %v765_v28 = vand.u32 2147483648, %v2483_v9  ;;  %v743_v16 = vmul.f32 %v742_v6, %v2386_v33 }
 0x1ed   :  { %v1759_v61 = vclamps-f32 %v728_v55, 1.0  ;;  %v790_v12 = vmul.f32 %v789_v13, %v2428_v44  ;;  %v811_v32 = vmul.f32 %v2532_v17, %v2532_v17  ;;  %v569_v46 = vmul.f32 %v472_v7, %v2267_v24 }
 0x1ee   :  { %v382_v22 = vpop.f32.mrf.mxu2  ;;  %v477_v10 = vsub.f32 1.5, %v476_v47  ;;  %vm759_vm1 = vweird.f32 %v2483_v9  ;;  %v780_v42 = vadd.f32 0.18741608, %v779_v18  ;;  %vm764_vm4 = vcmp.eq.f32.partialorder %v763_v3, 8.507059e+37 }
 0x1ef   :  { %v2505_v4 = vpop.eup %1836  ;;  %v2507_v49 = vadd.f32 1e-06, %v382_v22  ;;  %v1292_v14 = vadd.f32 1.0, %v1759_v61  ;;  %v791_v1 = vadd.f32 0.4994258, %v790_v12  ;;  %v766_v22 = vor.u32 1.1754944e-38, %v765_v28 }
 0x1f0   :  { %v1839_v59 = vpop.eup %1838  ;;  %v484_v57 = vmul.f32 %v2505_v4, %v2475_v5  ;;  %v478_v41 = vmul.f32 %v2472_v26, %v477_v10  ;;  %v2562_v43 = vmin.f32 %v811_v32, 16.0  ;;  %v588_v47 = vmul.f32 %v2318_v38, %v568_v60 }
 0x1f1   :  { %1840 = vrsqrt.f32 %v2507_v49  ;;  %v755_v2 = vmul.f32 %v1839_v59, %v2483_v9  ;;  %v1308_v23 = vmul.f32 %v1292_v14, %v2464_v15  ;;  %vm760_vm0 = vweird.f32 %v1839_v59 }
 0x1f2   :  { %v485_v19 = vmul.f32 %v2505_v4, %v484_v57  ;;  %vm761_vm2 = vmor %vm759_vm1, %vm760_vm0  ;;  %v792_v37 = vmul.f32 %v791_v1, %v2428_v44  ;;  %v482_v52 = vsel %vm2556_vm3, %v2472_v26, %v478_v41  ;;  %v781_v56 = vmul.f32 %v780_v42, %v2428_v44 }
 0x1f3   :  { %v756_v21 = vsub.f32 1.0, %v755_v2  ;;  %1416 = vmatmul.f32.gmra.mxu3 %v1308_v23  ;;  %1481 = vmatmul.f32.gmra.mxu0 %v1308_v23  ;;  %v813_v57 = vmul.f32 2.1237322e-06, %v2562_v43  ;;  %v824_v50 = vmul.f32 3.8918573e-05, %v2562_v43  ;;  %v621_v61 = vmul.f32 0.5, %v2374_v20 }
 0x1f4   :  { %v486_v8 = vmul.f32 0.5, %v485_v19  ;;  %1546 = vmatmul.f32.gmra.mxu1 %v1308_v23  ;;  %1611 = vmatmul.f32.gmra.mxu2 %v1308_v23  ;;  %v2568_v55 = vadd.f32 1.0, %v792_v37  ;;  %v2578_v2 = vmul.f32 0.5, %v2398_v58  ;;  %v570_v10 = vmul.f32 %v482_v52, %v2271_v27 }
 0x1f5   :  { %v757_v30 = vmul.f32 %v1839_v59, %v756_v21  ;;  %v814_v7 = vadd.f32 0.00028619796, %v813_v57  ;;  %v825_v14 = vadd.f32 0.001143296, %v824_v50  ;;  %v2586_v21 = vadd.f32 %v2324_v53, %v588_v47 }
 0x1f6   :  { %v385_v29 = vpop.f32.mrf.mxu2  ;;  %v487_v40 = vsub.f32 1.5, %v486_v8  ;;  %vm490_vm5 = vweird.f32 %v2505_v4  ;;  %v782_v19 = vadd.f32 1.1283791, %v781_v56  ;;  %vm489_vm6 = vweird.f32 %v2475_v5 }
 0x1f7   :  { %v2541_v34 = vpop.eup %1840  ;;  %v2544_v63 = vadd.f32 1e-06, %v385_v29  ;;  %v758_v15 = vadd.f32 %v1839_v59, %v757_v30  ;;  %v815_v3 = vmul.f32 %v814_v7, %v2562_v43  ;;  %v826_v23 = vmul.f32 %v825_v14, %v2562_v43  ;;  %vm2610_vm7 = vmor %vm489_vm6, %vm490_vm5 }
 0x1f8   :  { %v494_v33 = vmul.f32 %v2541_v34, %v2507_v49  ;;  %v488_v58 = vmul.f32 %v2505_v4, %v487_v40  ;;  %v2600_v30 = vmul.f32 %v2318_v38, %v570_v10  ;;  %v2603_v32 = vmul.f32 0.5, %v2511_v0 }
 0x1f9   :  { %1842 = vrsqrt.f32 %v2544_v63  ;;  %v762_v9 = vsel %vm761_vm2, %v1839_v59, %v758_v15  ;;  %v589_v59 = vmul.f32 %v2318_v38, %v569_v46  ;;  %v816_v41 = vadd.f32 0.0036580483, %v815_v3 }
 0x1fa   :  { %v767_v36 = vsel %vm764_vm4, %v766_v22, %v762_v9  ;;  %1844 = vrcp.f32 %v2568_v55  ;;  %v495_v60 = vmul.f32 %v2541_v34, %v494_v33  ;;  %vm500_vm8 = vweird.f32 %v2541_v34 }
 0x1fb   :  { %v768_v25 = vmul.f32 %v767_v36, %v743_v16  ;;  %v2595_v27 = vadd.f32 %v2324_v53, %v589_v59  ;;  %v2606_v16 = vmul.f32 0.70710677, %v2586_v21  ;;  %v783_v46 = vmul.f32 %v782_v19, %v2410_v11 }
 0x1fc   :  { %v496_v28 = vmul.f32 0.5, %v495_v60  ;;  %v827_v15 = vadd.f32 0.014752088, %v826_v23  ;;  %v492_v42 = vsel %vm2610_vm7, %v2505_v4, %v488_v58  ;;  %v817_v8 = vmul.f32 %v816_v41, %v2562_v43 }
 0x1fd   :  { %v1760_v26 = vclamps-f32 %v768_v25, 1.0  ;;  %v851_v22 = vmul.f32 %v2606_v16, %v2606_v16  ;;  %v2625_v37 = vmul.f32 0.70710677, %v2595_v27  ;;  %vm499_vm9 = vweird.f32 %v2507_v49 }
 0x1fe   :  { %v388_v6 = vpop.f32.mrf.mxu2  ;;  %v497_v24 = vsub.f32 1.5, %v496_v28  ;;  %v803_v33 = vand.u32 2147483647, %v2568_v55  ;;  %v828_v47 = vmul.f32 %v827_v15, %v2562_v43  ;;  %v805_v52 = vand.u32 2147483648, %v2568_v55  ;;  %vm2663_vm15 = vmor %vm499_vm9, %vm500_vm8 }
 0x1ff   :  { %v2580_v44 = vpop.eup %1842  ;;  %v2583_v13 = vadd.f32 1e-06, %v388_v6  ;;  %v1293_v18 = vadd.f32 1.0, %v1760_v26  ;;  %v818_v25 = vadd.f32 0.05243302, %v817_v8  ;;  %v2635_v56 = vmin.f32 %v851_v22, 16.0 }
 0x200   :  { %v504_v20 = vmul.f32 %v2580_v44, %v2544_v63  ;;  %v1845_v29 = vpop.eup %1844  ;;  %v571_v40 = vmul.f32 %v492_v42, %v2275_v31  ;;  %v891_v60 = vmul.f32 %v2625_v37, %v2625_v37  ;;  %vm799_vm11 = vweird.f32 %v2568_v55 }
 0x201   :  { %1846 = vrsqrt.f32 %v2583_v13  ;;  %v1309_v12 = vmul.f32 %v1293_v18, %v621_v61  ;;  %v795_v0 = vmul.f32 %v1845_v29, %v2568_v55  ;;  %vm800_vm10 = vweird.f32 %v1845_v29 }
 0x202   :  { %v505_v5 = vmul.f32 %v2580_v44, %v504_v20  ;;  %v829_v61 = vadd.f32 0.112945676, %v828_v47  ;;  %v853_v7 = vmul.f32 2.1237322e-06, %v2635_v56  ;;  %vm509_vm12 = vweird.f32 %v2544_v63  ;;  %vm801_vm13 = vmor %vm799_vm11, %vm800_vm10 }
 0x203   :  { %1419 = vmatmul.f32.gmra.mxu3 %v1309_v12  ;;  %1484 = vmatmul.f32.gmra.mxu0 %v1309_v12  ;;  %v796_v11 = vsub.f32 1.0, %v795_v0  ;;  %vm804_vm14 = vcmp.eq.f32.partialorder %v803_v33, 8.507059e+37  ;;  %v806_v10 = vor.u32 1.1754944e-38, %v805_v52  ;;  %v819_v31 = vmul.f32 %v818_v25, %v2562_v43 }
 0x204   :  { %1549 = vmatmul.f32.gmra.mxu1 %v1309_v12  ;;  %1614 = vmatmul.f32.gmra.mxu2 %v1309_v12  ;;  %v506_v57 = vmul.f32 0.5, %v505_v5  ;;  %v830_v14 = vmul.f32 %v829_v61, %v2562_v43  ;;  %v498_v20 = vmul.f32 %v2541_v34, %v497_v24  ;;  %v854_v58 = vadd.f32 0.00028619796, %v853_v7 }
 0x205   :  { %v797_v59 = vmul.f32 %v1845_v29, %v796_v11  ;;  %v864_v55 = vmul.f32 3.8918573e-05, %v2635_v56  ;;  %v2651_v12 = vmin.f32 %v891_v60, 16.0  ;;  %v2654_v5 = vmul.f32 0.5, %v2586_v21 }
 0x206   :  { %v391_v9 = vpop.f32.mrf.mxu2  ;;  %v507_v18 = vsub.f32 1.5, %v506_v57  ;;  %v831_v28 = vadd.f32 0.4994258, %v830_v14  ;;  %v855_v0 = vmul.f32 %v854_v58, %v2635_v56  ;;  %vm510_vm0 = vweird.f32 %v2580_v44 }
 0x207   :  { %v2630_v4 = vpop.eup %1846  ;;  %v2633_v36 = vadd.f32 1e-06, %v391_v9  ;;  %v798_v6 = vadd.f32 %v1845_v29, %v797_v59  ;;  %v502_v8 = vsel %vm2663_vm15, %v2541_v34, %v498_v20  ;;  %v865_v33 = vadd.f32 0.001143296, %v864_v55  ;;  %vm2697_vm1 = vmor %vm509_vm12, %vm510_vm0 }
 0x208   :  { %v514_v50 = vmul.f32 %v2630_v4, %v2583_v13  ;;  %v832_v21 = vmul.f32 %v831_v28, %v2562_v43  ;;  %v508_v22 = vmul.f32 %v2580_v44, %v507_v18  ;;  %v893_v9 = vmul.f32 2.1237322e-06, %v2651_v12 }
 0x209   :  { %1848 = vrsqrt.f32 %v2633_v36  ;;  %v802_v19 = vsel %vm801_vm13, %v1845_v29, %v798_v6  ;;  %v856_v57 = vadd.f32 0.0036580483, %v855_v0  ;;  %v2683_v34 = vmul.f32 %v2318_v38, %v571_v40 }
 0x20a   :  { %v515_v26 = vmul.f32 %v2630_v4, %v514_v50  ;;  %v807_v3 = vsel %vm804_vm14, %v806_v10, %v802_v19  ;;  %v2678_v11 = vadd.f32 1.0, %v832_v21  ;;  %v2688_v59 = vmul.f32 0.5, %v2595_v27 }
 0x20b   :  { %v808_v41 = vmul.f32 %v807_v3, %v783_v46  ;;  %v820_v46 = vadd.f32 0.18741608, %v819_v31  ;;  %v2691_v61 = vmul.f32 %v502_v8, %v2279_v35  ;;  %vm519_vm2 = vweird.f32 %v2583_v13 }
 0x20c   :  { %v516_v23 = vmul.f32 0.5, %v515_v26  ;;  %v512_v27 = vsel %vm2697_vm1, %v2580_v44, %v508_v22  ;;  %v866_v40 = vmul.f32 %v865_v33, %v2635_v56  ;;  %v894_v26 = vadd.f32 0.00028619796, %v893_v9 }
 0x20d   :  { %v1761_v24 = vclamps-f32 %v808_v41, 1.0  ;;  %v821_v50 = vmul.f32 %v820_v46, %v2562_v43  ;;  %v857_v43 = vmul.f32 %v856_v57, %v2635_v56  ;;  %vm520_vm3 = vweird.f32 %v2630_v4 }
 0x20e   :  { %v394_v1 = vpop.f32.mrf.mxu2  ;;  %v517_v47 = vsub.f32 1.5, %v516_v23  ;;  %vm529_vm4 = vweird.f32 %v2633_v36  ;;  %v867_v14 = vadd.f32 0.014752088, %v866_v40  ;;  %v895_v20 = vmul.f32 %v894_v26, %v2651_v12  ;;  %vm2729_vm6 = vmor %vm519_vm2, %vm520_vm3 }
 0x20f   :  { %v2657_v15 = vpop.eup %1848  ;;  %v2668_v42 = vadd.f32 1e-06, %v394_v1  ;;  %v1294_v52 = vadd.f32 1.0, %v1761_v24  ;;  %v858_v7 = vadd.f32 0.05243302, %v857_v43  ;;  %v573_v18 = vmul.f32 %v512_v27, %v2284_v39 }
 0x210   :  { %v524_v49 = vmul.f32 %v2657_v15, %v2633_v36  ;;  %v518_v63 = vmul.f32 %v2630_v4, %v517_v47  ;;  %v822_v44 = vadd.f32 1.1283791, %v821_v50  ;;  %vm530_vm5 = vweird.f32 %v2657_v15 }
 0x211   :  { %1850 = vrsqrt.f32 %v2668_v42  ;;  %v1310_v38 = vmul.f32 %v1294_v52, %v2578_v2  ;;  %v2712_v2 = vadd.f32 %v2324_v53, %v2600_v30  ;;  %v904_v30 = vmul.f32 3.8918573e-05, %v2651_v12  ;;  %vm2759_vm9 = vmor %vm529_vm4, %vm530_vm5 }
 0x212   :  { %v525_v25 = vmul.f32 %v2657_v15, %v524_v49  ;;  %1852 = vrcp.f32 %v2678_v11  ;;  %v868_v39 = vmul.f32 %v867_v14, %v2635_v56  ;;  %v896_v28 = vadd.f32 0.0036580483, %v895_v20 }
 0x213   :  { %1422 = vmatmul.f32.gmra.mxu3 %v1310_v38  ;;  %1487 = vmatmul.f32.gmra.mxu0 %v1310_v38  ;;  %v522_v55 = vsel %vm2729_vm6, %v2630_v4, %v518_v63  ;;  %v859_v13 = vmul.f32 %v858_v7, %v2635_v56  ;;  %v823_v1 = vmul.f32 %v822_v44, %v2532_v17  ;;  %v843_v0 = vand.u32 2147483647, %v2678_v11 }
 0x214   :  { %v526_v35 = vmul.f32 0.5, %v525_v25  ;;  %1552 = vmatmul.f32.gmra.mxu1 %v1310_v38  ;;  %1617 = vmatmul.f32.gmra.mxu2 %v1310_v38  ;;  %v869_v29 = vadd.f32 0.112945676, %v868_v39  ;;  %v897_v46 = vmul.f32 %v896_v28, %v2651_v12  ;;  %v845_v22 = vand.u32 2147483648, %v2678_v11 }
 0x215   :  { %v905_v24 = vadd.f32 0.001143296, %v904_v30  ;;  %v574_v4 = vmul.f32 %v522_v55, %v2289_v45  ;;  %v860_v47 = vadd.f32 0.18741608, %v859_v13  ;;  %v2749_v52 = vmul.f32 0.70710677, %v2712_v2 }
 0x216   :  { %v397_v6 = vpop.f32.mrf.mxu2  ;;  %v527_v3 = vsub.f32 1.5, %v526_v35  ;;  %v870_v33 = vmul.f32 %v869_v29, %v2635_v56  ;;  %v898_v17 = vadd.f32 0.05243302, %v897_v46  ;;  %vm839_vm8 = vweird.f32 %v2678_v11  ;;  %v2813_v29 = vld [vmem:[#allocation7] ss:$0 sm:$0xff] }
 0x217   :  { %v2714_v10 = vpop.eup %1850  ;;  %v2717_v31 = vadd.f32 1e-06, %v397_v6  ;;  %v906_v45 = vmul.f32 %v905_v24, %v2651_v12  ;;  %vm844_vm10 = vcmp.eq.f32.partialorder %v843_v0, 8.507059e+37  ;;  %v846_v27 = vor.u32 1.1754944e-38, %v845_v22 }
 0x218   :  { %v534_v53 = vmul.f32 %v2714_v10, %v2668_v42  ;;  %v1853_v19 = vpop.eup %1852  ;;  %v528_v49 = vmul.f32 %v2657_v15, %v527_v3  ;;  %v871_v50 = vadd.f32 0.4994258, %v870_v33  ;;  %vm540_vm11 = vweird.f32 %v2714_v10 }
 0x219   :  { %1854 = vrsqrt.f32 %v2717_v31  ;;  %v835_v41 = vmul.f32 %v1853_v19, %v2678_v11  ;;  %vm840_vm7 = vweird.f32 %v1853_v19  ;;  %v861_v63 = vmul.f32 %v860_v47, %v2635_v56 }
 0x21a   :  { %v535_v23 = vmul.f32 %v2714_v10, %v534_v53  ;;  %v532_v11 = vsel %vm2759_vm9, %v2657_v15, %v528_v49  ;;  %vm841_vm12 = vmor %vm839_vm8, %vm840_vm7  ;;  %v872_v36 = vmul.f32 %v871_v50, %v2635_v56  ;;  %v899_v6 = vmul.f32 %v898_v17, %v2651_v12 }
 0x21b   :  { %v836_v8 = vsub.f32 1.0, %v835_v41  ;;  %v931_v7 = vmul.f32 %v2749_v52, %v2749_v52  ;;  %v907_v20 = vadd.f32 0.014752088, %v906_v45  ;;  %v575_v53 = vmul.f32 %v532_v11, %v2294_v48 }
 0x21c   :  { %v536_v21 = vmul.f32 0.5, %v535_v23  ;;  %v2778_v15 = vadd.f32 1.0, %v872_v36  ;;  %vm539_vm13 = vweird.f32 %v2668_v42  ;;  %v862_v55 = vadd.f32 1.1283791, %v861_v63 }
 0x21d   :  { %v837_v9 = vmul.f32 %v1853_v19, %v836_v8  ;;  %vm2797_vm14 = vmor %vm539_vm13, %vm540_vm11  ;;  %v900_v23 = vadd.f32 0.18741608, %v899_v6  ;;  %v908_v42 = vmul.f32 %v907_v20, %v2651_v12  ;;  %v2808_v41 = vmin.f32 %v931_v7, 16.0 }
 0x21e   :  { %v537_v57 = vsub.f32 1.5, %v536_v21  ;;  %v400_v60 = vpop.f32.mrf.mxu2  ;;  %v611_v46 = vadd.f32 %v2813_v29, %v2683_v34  ;;  %vm549_vm15 = vweird.f32 %v2717_v31  ;;  %vm879_vm1 = vweird.f32 %v2778_v15 }
 0x21f   :  { %v2751_v25 = vpop.eup %1854  ;;  %v838_v43 = vadd.f32 %v1853_v19, %v837_v9  ;;  %v2771_v40 = vadd.f32 1e-06, %v400_v60  ;;  %v944_v21 = vmul.f32 3.8918573e-05, %v2808_v41  ;;  %v901_v49 = vmul.f32 %v900_v23, %v2651_v12 }
 0x220   :  { %v544_v35 = vmul.f32 %v2751_v25, %v2717_v31  ;;  %v538_v44 = vmul.f32 %v2714_v10, %v537_v57  ;;  %vm550_vm0 = vweird.f32 %v2751_v25 }
 0x221   :  { %v842_v26 = vsel %vm841_vm12, %v1853_v19, %v838_v43  ;;  %1856 = vrsqrt.f32 %v2771_v40  ;;  %v2783_v19 = vld [vmem:[#allocation5] ss:$0 sm:$0xff]  ;;  %v945_v47 = vadd.f32 0.001143296, %v944_v21  ;;  %v885_v43 = vand.u32 2147483648, %v2778_v15  ;;  %vm2858_vm3 = vmor %vm549_vm15, %vm550_vm0 }
 0x222   :  { %v847_v14 = vsel %vm844_vm10, %v846_v27, %v842_v26  ;;  %v545_v58 = vmul.f32 %v2751_v25, %v544_v35  ;;  %v592_v56 = vmul.f32 %v2783_v19, %v2691_v61  ;;  %v2788_v3 = vmul.f32 %v2783_v19, %v573_v18 }
 0x223   :  { %v848_v30 = vmul.f32 %v847_v14, %v823_v1  ;;  %1858 = vrcp.f32 %v2778_v15  ;;  %v2793_v39 = vmul.f32 %v2783_v19, %v574_v4  ;;  %v542_v61 = vsel %vm2797_vm14, %v2714_v10, %v538_v44 }
 0x224   :  { %v2806_v18 = vmul.f32 0.5, %v2712_v2  ;;  %v2811_v13 = vmul.f32 %v2783_v19, %v575_v53  ;;  %v546_v0 = vmul.f32 0.5, %v545_v58  ;;  %v909_v10 = vadd.f32 0.112945676, %v908_v42 }
 0x225   :  { %v1762_v28 = vclamps-f32 %v848_v30, 1.0  ;;  %v933_v2 = vmul.f32 2.1237322e-06, %v2808_v41  ;;  %v576_v22 = vmul.f32 %v542_v61, %v2299_v51  ;;  %v863_v4 = vmul.f32 %v862_v55, %v2606_v16 }
 0x226   :  { %v910_v33 = vmul.f32 %v909_v10, %v2651_v12  ;;  %v2829_v17 = vadd.f32 %v2813_v29, %v592_v56  ;;  %v547_v57 = vsub.f32 1.5, %v546_v0  ;;  %v2833_v51 = vmul.f32 0.70710677, %v611_v46 }
 0x227   :  { %v1295_v1 = vadd.f32 1.0, %v1762_v28  ;;  %v2821_v8 = vpop.eup %1856  ;;  %v934_v9 = vadd.f32 0.00028619796, %v933_v2  ;;  %v946_v45 = vmul.f32 %v945_v47, %v2808_v41  ;;  %v902_v14 = vadd.f32 1.1283791, %v901_v49 }
 0x228   :  { %v911_v16 = vadd.f32 0.4994258, %v910_v33  ;;  %v554_v27 = vmul.f32 %v2821_v8, %v2771_v40  ;;  %v971_v35 = vmul.f32 %v2833_v51, %v2833_v51  ;;  %v2845_v63 = vmul.f32 0.70710677, %v2829_v17 }
 0x229   :  { %v1311_v24 = vmul.f32 %v1295_v1, %v2603_v32  ;;  %v1859_v34 = vpop.eup %1858  ;;  %v883_v32 = vand.u32 2147483647, %v2778_v15  ;;  %v935_v60 = vmul.f32 %v934_v9, %v2808_v41  ;;  %v947_v26 = vadd.f32 0.014752088, %v946_v45 }
 0x22a   :  { %v875_v50 = vmul.f32 %v1859_v34, %v2778_v15  ;;  %v912_v11 = vmul.f32 %v911_v16, %v2651_v12  ;;  %v548_v6 = vmul.f32 %v2751_v25, %v547_v57  ;;  %vm880_vm2 = vweird.f32 %v1859_v34 }
 0x22b   :  { %1425 = vmatmul.f32.gmra.mxu3 %v1311_v24  ;;  %1490 = vmatmul.f32.gmra.mxu0 %v1311_v24  ;;  %v936_v36 = vadd.f32 0.0036580483, %v935_v60  ;;  %v2848_v44 = vmin.f32 %v971_v35, 16.0  ;;  %v948_v30 = vmul.f32 %v947_v26, %v2808_v41  ;;  %vm884_vm4 = vcmp.eq.f32.partialorder %v883_v32, 8.507059e+37  ;;  %vm881_vm5 = vmor %vm879_vm1, %vm880_vm2 }
 0x22c   :  { %1555 = vmatmul.f32.gmra.mxu1 %v1311_v24  ;;  %1620 = vmatmul.f32.gmra.mxu2 %v1311_v24  ;;  %v876_v38 = vsub.f32 1.0, %v875_v50  ;;  %v2850_v20 = vadd.f32 1.0, %v912_v11  ;;  %v886_v56 = vor.u32 1.1754944e-38, %v885_v43  ;;  %v555_v28 = vmul.f32 %v2821_v8, %v554_v27 }
 0x22d   :  { %v937_v53 = vmul.f32 %v936_v36, %v2808_v41  ;;  %v973_v48 = vmul.f32 2.1237322e-06, %v2848_v44  ;;  %v984_v55 = vmul.f32 3.8918573e-05, %v2848_v44  ;;  %v1011_v31 = vmul.f32 %v2845_v63, %v2845_v63 }
 0x22e   :  { %v877_v7 = vmul.f32 %v1859_v34, %v876_v38  ;;  %1860 = vrcp.f32 %v2850_v20  ;;  %v552_v23 = vsel %vm2858_vm3, %v2751_v25, %v548_v6  ;;  %v949_v1 = vadd.f32 0.112945676, %v948_v30 }
 0x22f   :  { %v938_v42 = vadd.f32 0.05243302, %v937_v53  ;;  %v2874_v0 = vmul.f32 %v2783_v19, %v576_v22  ;;  %v2877_v10 = vmul.f32 %v902_v14, %v2625_v37  ;;  %v2879_v2 = vmul.f32 0.5, %v611_v46 }
 0x230   :  { %v878_v58 = vadd.f32 %v1859_v34, %v877_v7  ;;  %v950_v49 = vmul.f32 %v949_v1, %v2808_v41  ;;  %v974_v33 = vadd.f32 0.00028619796, %v973_v48  ;;  %v577_v25 = vmul.f32 %v552_v23, %v2304_v54 }
 0x231   :  { %v939_v24 = vmul.f32 %v938_v42, %v2808_v41  ;;  %v985_v9 = vadd.f32 0.001143296, %v984_v55  ;;  %v2886_v47 = vmin.f32 %v1011_v31, 16.0  ;;  %v2891_v46 = vadd.f32 %v2813_v29, %v2788_v3 }
 0x232   :  { %v882_v61 = vsel %vm881_vm5, %v1859_v34, %v878_v58  ;;  %v2884_v34 = vmul.f32 0.5, %v555_v28  ;;  %v951_v57 = vadd.f32 0.4994258, %v950_v49  ;;  %v975_v37 = vmul.f32 %v974_v33, %v2848_v44 }
 0x233   :  { %v887_v15 = vsel %vm884_vm4, %v886_v56, %v882_v61  ;;  %v923_v50 = vand.u32 2147483647, %v2850_v20  ;;  %v986_v32 = vmul.f32 %v985_v9, %v2848_v44  ;;  %v1013_v54 = vmul.f32 2.1237322e-06, %v2886_v47 }
 0x234   :  { %v888_v21 = vmul.f32 %v887_v15, %v863_v4  ;;  %v1861_v4 = vpop.eup %1860  ;;  %v1024_v16 = vmul.f32 3.8918573e-05, %v2886_v47  ;;  %v925_v38 = vand.u32 2147483648, %v2850_v20  ;;  %v940_v43 = vadd.f32 0.18741608, %v939_v24 }
 0x235   :  { %v915_v45 = vmul.f32 %v1861_v4, %v2850_v20  ;;  %v952_v27 = vmul.f32 %v951_v57, %v2808_v41  ;;  %v976_v35 = vadd.f32 0.0036580483, %v975_v37  ;;  %v987_v3 = vadd.f32 0.014752088, %v986_v32 }
 0x236   :  { %v1763_v22 = vclamps-f32 %v888_v21, 1.0  ;;  %v1014_v11 = vadd.f32 0.00028619796, %v1013_v54  ;;  %v1025_v6 = vadd.f32 0.001143296, %v1024_v16  ;;  %v2910_v58 = vmul.f32 %v2783_v19, %v577_v25 }
 0x237   :  { %v916_v26 = vsub.f32 1.0, %v915_v45  ;;  %v2902_v7 = vmul.f32 0.70710677, %v2891_v46  ;;  %v2904_v14 = vadd.f32 1.0, %v952_v27  ;;  %v977_v53 = vmul.f32 %v976_v35, %v2848_v44 }
 0x238   :  { %v1296_v60 = vadd.f32 1.0, %v1763_v22  ;;  %v988_v30 = vmul.f32 %v987_v3, %v2848_v44  ;;  %v1015_v12 = vmul.f32 %v1014_v11, %v2886_v47  ;;  %vm920_vm6 = vweird.f32 %v1861_v4 }
 0x239   :  { %v917_v56 = vmul.f32 %v1861_v4, %v916_v26  ;;  %v557_v48 = vsub.f32 1.5, %v2884_v34  ;;  %vm919_vm7 = vweird.f32 %v2850_v20  ;;  %vm924_vm8 = vcmp.eq.f32.partialorder %v923_v50, 8.507059e+37 }
 0x23a   :  { %v1312_v36 = vmul.f32 %v1296_v60, %v2654_v5  ;;  %v1026_v5 = vmul.f32 %v1025_v6, %v2886_v47  ;;  %1862 = vrcp.f32 %v2904_v14  ;;  %v978_v55 = vadd.f32 0.05243302, %v977_v53  ;;  %vm921_vm9 = vmor %vm919_vm7, %vm920_vm6 }
 0x23b   :  { %v918_v28 = vadd.f32 %v1861_v4, %v917_v56  ;;  %v989_v31 = vadd.f32 0.112945676, %v988_v30  ;;  %v1016_v23 = vadd.f32 0.0036580483, %v1015_v12  ;;  %v926_v61 = vor.u32 1.1754944e-38, %v925_v38 }
 0x23c   :  { %1428 = vmatmul.f32.gmra.mxu3 %v1312_v36  ;;  %1493 = vmatmul.f32.gmra.mxu0 %v1312_v36  ;;  %v941_v42 = vmul.f32 %v940_v43, %v2808_v41  ;;  %v1027_v1 = vadd.f32 0.014752088, %v1026_v5  ;;  %v1051_v15 = vmul.f32 %v2902_v7, %v2902_v7  ;;  %v979_v24 = vmul.f32 %v978_v55, %v2848_v44 }
 0x23d   :  { %1558 = vmatmul.f32.gmra.mxu1 %v1312_v36  ;;  %1623 = vmatmul.f32.gmra.mxu2 %v1312_v36  ;;  %v922_v21 = vsel %vm921_vm9, %v1861_v4, %v918_v28  ;;  %v990_v20 = vmul.f32 %v989_v31, %v2848_v44  ;;  %v1017_v49 = vmul.f32 %v1016_v23, %v2886_v47  ;;  %v2923_v25 = vmul.f32 0.5, %v2829_v17 }
 0x23e   :  { %v927_v33 = vsel %vm924_vm8, %v926_v61, %v922_v21  ;;  %v1028_v34 = vmul.f32 %v1027_v1, %v2886_v47  ;;  %v2926_v9 = vmin.f32 %v1051_v15, 16.0  ;;  %vm560_vm10 = vweird.f32 %v2821_v8 }
 0x23f   :  { %v928_v41 = vmul.f32 %v927_v33, %v2877_v10  ;;  %v980_v22 = vadd.f32 0.18741608, %v979_v24  ;;  %v991_v57 = vadd.f32 0.4994258, %v990_v20  ;;  %v1018_v37 = vadd.f32 0.05243302, %v1017_v49 }
 0x240   :  { %v1863_v4 = vpop.eup %1862  ;;  %v2931_v50 = vmul.f32 %v2821_v8, %v557_v48  ;;  %v1029_v32 = vadd.f32 0.112945676, %v1028_v34  ;;  %v1053_v54 = vmul.f32 2.1237322e-06, %v2926_v9  ;;  %v1064_v17 = vmul.f32 3.8918573e-05, %v2926_v9 }
 0x241   :  { %vm559_vm11 = vweird.f32 %v2771_v40  ;;  %v1764_v16 = vclamps-f32 %v928_v41, 1.0  ;;  %v942_v60 = vadd.f32 1.1283791, %v941_v42  ;;  %v955_v45 = vmul.f32 %v1863_v4, %v2904_v14 }
 0x242   :  { %v963_v10 = vand.u32 2147483647, %v2904_v14  ;;  %v965_v38 = vand.u32 2147483648, %v2904_v14  ;;  %v992_v43 = vmul.f32 %v991_v57, %v2848_v44  ;;  %v1030_v27 = vmul.f32 %v1029_v32, %v2886_v47  ;;  %vm2969_vm0 = vmor %vm559_vm11, %vm560_vm10 }
 0x243   :  { %v1054_v35 = vadd.f32 0.00028619796, %v1053_v54  ;;  %v1297_v3 = vadd.f32 1.0, %v1764_v16  ;;  %v956_v11 = vsub.f32 1.0, %v955_v45  ;;  %v981_v36 = vmul.f32 %v980_v22, %v2848_v44 }
 0x244   :  { %v1065_v26 = vadd.f32 0.001143296, %v1064_v17  ;;  %v2942_v6 = vadd.f32 1.0, %v992_v43  ;;  %v1019_v53 = vmul.f32 %v1018_v37, %v2886_v47  ;;  %v1031_v30 = vadd.f32 0.4994258, %v1030_v27 }
 0x245   :  { %v1055_v12 = vmul.f32 %v1054_v35, %v2926_v9  ;;  %v1313_v56 = vmul.f32 %v1297_v3, %v2688_v59  ;;  %v957_v5 = vmul.f32 %v1863_v4, %v956_v11  ;;  %vm960_vm12 = vweird.f32 %v1863_v4 }
 0x246   :  { %v1066_v48 = vmul.f32 %v1065_v26, %v2926_v9  ;;  %vm959_vm13 = vweird.f32 %v2904_v14  ;;  %vm2949_vm14 = vcmp.eq.f32.partialorder %v963_v10, 8.507059e+37  ;;  %1864 = vrcp.f32 %v2942_v6 }
 0x247   :  { %v2956_v44 = vadd.f32 %v2813_v29, %v2793_v39  ;;  %1431 = vmatmul.f32.gmra.mxu3 %v1313_v56  ;;  %1496 = vmatmul.f32.gmra.mxu0 %v1313_v56  ;;  %v958_v55 = vadd.f32 %v1863_v4, %v957_v5  ;;  %v966_v59 = vor.u32 1.1754944e-38, %v965_v38  ;;  %v1032_v31 = vmul.f32 %v1031_v30, %v2886_v47  ;;  %vm961_vm15 = vmor %vm959_vm13, %vm960_vm12 }
 0x248   :  { %v1056_v23 = vadd.f32 0.0036580483, %v1055_v12  ;;  %1561 = vmatmul.f32.gmra.mxu1 %v1313_v56  ;;  %1626 = vmatmul.f32.gmra.mxu2 %v1313_v56  ;;  %v943_v14 = vmul.f32 %v942_v60, %v2749_v52  ;;  %v982_v61 = vadd.f32 1.1283791, %v981_v36  ;;  %v1020_v42 = vadd.f32 0.18741608, %v1019_v53 }
 0x249   :  { %v1067_v1 = vadd.f32 0.014752088, %v1066_v48  ;;  %v962_v15 = vsel %vm961_vm15, %v1863_v4, %v958_v55  ;;  %v1003_v39 = vand.u32 2147483647, %v2942_v6  ;;  %v2962_v21 = vadd.f32 1.0, %v1032_v31 }
 0x24a   :  { %v1057_v24 = vmul.f32 %v1056_v23, %v2926_v9  ;;  %v967_v52 = vsel %vm2949_vm14, %v966_v59, %v962_v15  ;;  %v1005_v49 = vand.u32 2147483648, %v2942_v6  ;;  %v2978_v34 = vmul.f32 0.70710677, %v2956_v44 }
 0x24b   :  { %v1068_v33 = vmul.f32 %v1067_v1, %v2926_v9  ;;  %v562_v41 = vsel %vm2969_vm0, %v2821_v8, %v2931_v50  ;;  %v968_v40 = vmul.f32 %v967_v52, %v943_v14  ;;  %1866 = vrcp.f32 %v2962_v21 }
 0x24c   :  { %v2987_v22 = vadd.f32 %v2813_v29, %v2811_v13  ;;  %v1865_v57 = vpop.eup %1864  ;;  %v983_v37 = vmul.f32 %v982_v61, %v2833_v51  ;;  %vm999_vm1 = vweird.f32 %v2942_v6  ;;  %v1058_v4 = vadd.f32 0.05243302, %v1057_v24 }
 0x24d   :  { %v1091_v32 = vmul.f32 %v2978_v34, %v2978_v34  ;;  %v1765_v54 = vclamps-f32 %v968_v40, 1.0  ;;  %v995_v17 = vmul.f32 %v1865_v57, %v2942_v6  ;;  %v1021_v16 = vmul.f32 %v1020_v42, %v2886_v47 }
 0x24e   :  { %v1069_v60 = vadd.f32 0.112945676, %v1068_v33  ;;  %vm2995_vm2 = vcmp.eq.f32.partialorder %v1003_v39, 8.507059e+37  ;;  %v1006_v13 = vor.u32 1.1754944e-38, %v1005_v49  ;;  %v1059_v10 = vmul.f32 %v1058_v4, %v2926_v9 }
 0x24f   :  { %v3000_v51 = vmin.f32 %v1091_v32, 16.0  ;;  %v1298_v38 = vadd.f32 1.0, %v1765_v54  ;;  %v996_v43 = vsub.f32 1.0, %v995_v17  ;;  %v3004_v35 = vmul.f32 0.70710677, %v2987_v22 }
 0x250   :  { %v1070_v27 = vmul.f32 %v1069_v60, %v2926_v9  ;;  %vm1000_vm3 = vweird.f32 %v1865_v57  ;;  %v1060_v3 = vadd.f32 0.18741608, %v1059_v10  ;;  %v1022_v56 = vadd.f32 1.1283791, %v1021_v16 }
 0x251   :  { %v1093_v47 = vmul.f32 2.1237322e-06, %v3000_v51  ;;  %v1104_v11 = vmul.f32 3.8918573e-05, %v3000_v51  ;;  %v1867_v36 = vpop.eup %1866  ;;  %v1314_v26 = vmul.f32 %v1298_v38, %v2806_v18  ;;  %v997_v53 = vmul.f32 %v1865_v57, %v996_v43  ;;  %vm1001_vm4 = vmor %vm999_vm1, %vm1000_vm3 }
 0x252   :  { %v1071_v30 = vadd.f32 0.4994258, %v1070_v27  ;;  %v1131_v12 = vmul.f32 %v3004_v35, %v3004_v35  ;;  %v1035_v5 = vmul.f32 %v1867_v36, %v2962_v21  ;;  %v1043_v48 = vand.u32 2147483647, %v2962_v21 }
 0x253   :  { %v1094_v28 = vadd.f32 0.00028619796, %v1093_v47  ;;  %1434 = vmatmul.f32.gmra.mxu3 %v1314_v26  ;;  %1499 = vmatmul.f32.gmra.mxu0 %v1314_v26  ;;  %v998_v55 = vadd.f32 %v1865_v57, %v997_v53  ;;  %v1105_v31 = vadd.f32 0.001143296, %v1104_v11  ;;  %v1045_v14 = vand.u32 2147483648, %v2962_v21 }
 0x254   :  { %v1072_v59 = vmul.f32 %v1071_v30, %v2926_v9  ;;  %v3014_v23 = vmin.f32 %v1131_v12, 16.0  ;;  %1564 = vmatmul.f32.gmra.mxu1 %v1314_v26  ;;  %1629 = vmatmul.f32.gmra.mxu2 %v1314_v26  ;;  %v1036_v18 = vsub.f32 1.0, %v1035_v5  ;;  %v1061_v61 = vmul.f32 %v1060_v3, %v2926_v9 }
 0x255   :  { %v1095_v42 = vmul.f32 %v1094_v28, %v3000_v51  ;;  %v1002_v1 = vsel %vm1001_vm4, %v1865_v57, %v998_v55  ;;  %v1106_v39 = vmul.f32 %v1105_v31, %v3000_v51  ;;  %vm1040_vm5 = vweird.f32 %v1867_v36 }
 0x256   :  { %v3022_v15 = vadd.f32 1.0, %v1072_v59  ;;  %v1133_v24 = vmul.f32 2.1237322e-06, %v3014_v23  ;;  %v1007_v52 = vsel %vm2995_vm2, %v1006_v13, %v1002_v1  ;;  %v1037_v49 = vmul.f32 %v1867_v36, %v1036_v18 }
 0x257   :  { %v1096_v6 = vadd.f32 0.0036580483, %v1095_v42  ;;  %v1008_v33 = vmul.f32 %v1007_v52, %v983_v37  ;;  %v1023_v40 = vmul.f32 %v1022_v56, %v2845_v63  ;;  %vm1039_vm6 = vweird.f32 %v2962_v21 }
 0x258   :  { %1868 = vrcp.f32 %v3022_v15  ;;  %v1038_v9 = vadd.f32 %v1867_v36, %v1037_v49  ;;  %v1062_v57 = vadd.f32 1.1283791, %v1061_v61  ;;  %v1107_v4 = vadd.f32 0.014752088, %v1106_v39  ;;  %vm1041_vm7 = vmor %vm1039_vm6, %vm1040_vm5 }
 0x259   :  { %v3033_v32 = vadd.f32 %v2813_v29, %v2874_v0  ;;  %v1766_v54 = vclamps-f32 %v1008_v33, 1.0  ;;  %v1046_v17 = vor.u32 1.1754944e-38, %v1045_v14  ;;  %v1134_v16 = vadd.f32 0.00028619796, %v1133_v24 }
 0x25a   :  { %v1144_v60 = vmul.f32 3.8918573e-05, %v3014_v23  ;;  %v1042_v37 = vsel %vm1041_vm7, %v1867_v36, %v1038_v9  ;;  %vm1044_vm8 = vcmp.eq.f32.partialorder %v1043_v48, 8.507059e+37  ;;  %v1097_v63 = vmul.f32 %v1096_v6, %v3000_v51 }
 0x25b   :  { %v1108_v21 = vmul.f32 %v1107_v4, %v3000_v51  ;;  %v1299_v45 = vadd.f32 1.0, %v1766_v54  ;;  %v1047_v13 = vsel %vm1044_vm8, %v1046_v17, %v1042_v37  ;;  %v1135_v10 = vmul.f32 %v1134_v16, %v3014_v23 }
 0x25c   :  { %v1145_v38 = vadd.f32 0.001143296, %v1144_v60  ;;  %v3045_v0 = vmul.f32 %v562_v41, %v2309_v62  ;;  %v1048_v43 = vmul.f32 %v1047_v13, %v1023_v40  ;;  %v3048_v3 = vmul.f32 0.70710677, %v3033_v32 }
 0x25d   :  { %v1109_v27 = vadd.f32 0.112945676, %v1108_v21  ;;  %v1315_v11 = vmul.f32 %v1299_v45, %v2879_v2  ;;  %v1063_v36 = vmul.f32 %v1062_v57, %v2902_v7  ;;  %v1136_v26 = vadd.f32 0.0036580483, %v1135_v10 }
 0x25e   :  { %v1869_v47 = vpop.eup %1868  ;;  %v1146_v53 = vmul.f32 %v1145_v38, %v3014_v23  ;;  %v1767_v30 = vclamps-f32 %v1048_v43, 1.0  ;;  %v1098_v12 = vadd.f32 0.05243302, %v1097_v63  ;;  %v3056_v62 = vadd.f32 %v2813_v29, %v2910_v58 }
 0x25f   :  { %v1075_v20 = vmul.f32 %v1869_v47, %v3022_v15  ;;  %1437 = vmatmul.f32.gmra.mxu3 %v1315_v11  ;;  %1502 = vmatmul.f32.gmra.mxu0 %v1315_v11  ;;  %vm1079_vm9 = vweird.f32 %v3022_v15  ;;  %v1110_v8 = vmul.f32 %v1109_v27, %v3000_v51  ;;  %v1171_v7 = vmul.f32 %v3048_v3, %v3048_v3 }
 0x260   :  { %v1147_v2 = vadd.f32 0.014752088, %v1146_v53  ;;  %1567 = vmatmul.f32.gmra.mxu1 %v1315_v11  ;;  %1632 = vmatmul.f32.gmra.mxu2 %v1315_v11  ;;  %v1300_v50 = vadd.f32 1.0, %v1767_v30  ;;  %v1083_v56 = vand.u32 2147483647, %v3022_v15  ;;  %v1085_v5 = vand.u32 2147483648, %v3022_v15 }
 0x261   :  { %v1076_v41 = vsub.f32 1.0, %v1075_v20  ;;  %v1111_v58 = vadd.f32 0.4994258, %v1110_v8  ;;  %v1137_v48 = vmul.f32 %v1136_v26, %v3014_v23  ;;  %v3066_v55 = vmin.f32 %v1171_v7, 16.0 }
 0x262   :  { %v1148_v28 = vmul.f32 %v1147_v2, %v3014_v23  ;;  %vm1080_vm10 = vweird.f32 %v1869_v47  ;;  %v1099_v31 = vmul.f32 %v1098_v12, %v3000_v51  ;;  %v3070_v18 = vmul.f32 0.70710677, %v3056_v62 }
 0x263   :  { %v1077_v59 = vmul.f32 %v1869_v47, %v1076_v41  ;;  %v1316_v14 = vmul.f32 %v1300_v50, %v2923_v25  ;;  %v1112_v61 = vmul.f32 %v1111_v58, %v3000_v51  ;;  %v1173_v1 = vmul.f32 2.1237322e-06, %v3066_v55  ;;  %vm1081_vm11 = vmor %vm1079_vm9, %vm1080_vm10 }
 0x264   :  { %v1149_v42 = vadd.f32 0.112945676, %v1148_v28  ;;  %v1086_v24 = vor.u32 1.1754944e-38, %v1085_v5  ;;  %v1184_v52 = vmul.f32 3.8918573e-05, %v3066_v55  ;;  %v1211_v49 = vmul.f32 %v3070_v18, %v3070_v18 }
 0x265   :  { %v1078_v39 = vadd.f32 %v1869_v47, %v1077_v59  ;;  %v3080_v6 = vadd.f32 1.0, %v1112_v61  ;;  %v1138_v33 = vadd.f32 0.05243302, %v1137_v48  ;;  %v1174_v40 = vadd.f32 0.00028619796, %v1173_v1 }
 0x266   :  { %v1150_v25 = vmul.f32 %v1149_v42, %v3014_v23  ;;  %vm1084_vm12 = vcmp.eq.f32.partialorder %v1083_v56, 8.507059e+37  ;;  %v1185_v57 = vadd.f32 0.001143296, %v1184_v52  ;;  %v3083_v4 = vmin.f32 %v1211_v49, 16.0 }
 0x267   :  { %v1082_v9 = vsel %vm1081_vm11, %v1869_v47, %v1078_v39  ;;  %1440 = vmatmul.f32.gmra.mxu3 %v1316_v14  ;;  %1505 = vmatmul.f32.gmra.mxu0 %v1316_v14  ;;  %v1100_v17 = vadd.f32 0.18741608, %v1099_v31  ;;  %1870 = vrcp.f32 %v3080_v6  ;;  %v1139_v60 = vmul.f32 %v1138_v33, %v3014_v23 }
 0x268   :  { %v1087_v54 = vsel %vm1084_vm12, %v1086_v24, %v1082_v9  ;;  %1570 = vmatmul.f32.gmra.mxu1 %v1316_v14  ;;  %1635 = vmatmul.f32.gmra.mxu2 %v1316_v14  ;;  %v1151_v16 = vadd.f32 0.4994258, %v1150_v25  ;;  %v1175_v37 = vmul.f32 %v1174_v40, %v3066_v55  ;;  %v1186_v63 = vmul.f32 %v1185_v57, %v3066_v55 }
 0x269   :  { %v1088_v15 = vmul.f32 %v1087_v54, %v1063_v36  ;;  %v1213_v21 = vmul.f32 2.1237322e-06, %v3083_v4  ;;  %v598_v45 = vmul.f32 %v2783_v19, %v3045_v0  ;;  %v1101_v38 = vmul.f32 %v1100_v17, %v3000_v51 }
 0x26a   :  { %v1152_v10 = vmul.f32 %v1151_v16, %v3014_v23  ;;  %v1187_v43 = vadd.f32 0.014752088, %v1186_v63  ;;  %v629_v27 = vmul.f32 0.5, %v2891_v46  ;;  %v1176_v36 = vadd.f32 0.0036580483, %v1175_v37 }
 0x26b   :  { %v1768_v13 = vclamps-f32 %v1088_v15, 1.0  ;;  %v1140_v53 = vadd.f32 0.18741608, %v1139_v60  ;;  %v1214_v20 = vadd.f32 0.00028619796, %v1213_v21  ;;  %v3102_v51 = vadd.f32 %v2813_v29, %v598_v45 }
 0x26c   :  { %v3095_v11 = vadd.f32 1.0, %v1152_v10  ;;  %v1188_v30 = vmul.f32 %v1187_v43, %v3066_v55  ;;  %v1224_v12 = vmul.f32 3.8918573e-05, %v3083_v4  ;;  %v1102_v46 = vadd.f32 1.1283791, %v1101_v38 }
 0x26d   :  { %v1301_v47 = vadd.f32 1.0, %v1768_v13  ;;  %v1871_v26 = vpop.eup %1870  ;;  %v1123_v8 = vand.u32 2147483647, %v3080_v6  ;;  %v1177_v7 = vmul.f32 %v1176_v36, %v3066_v55  ;;  %v1125_v41 = vand.u32 2147483648, %v3080_v6 }
 0x26e   :  { %v1115_v0 = vmul.f32 %v1871_v26, %v3080_v6  ;;  %1872 = vrcp.f32 %v3095_v11  ;;  %v1189_v50 = vadd.f32 0.112945676, %v1188_v30  ;;  %v1141_v56 = vmul.f32 %v1140_v53, %v3014_v23 }
 0x26f   :  { %v1317_v19 = vmul.f32 %v1301_v47, %v629_v27  ;;  %v1215_v5 = vmul.f32 %v1214_v20, %v3083_v4  ;;  %v1225_v58 = vadd.f32 0.001143296, %v1224_v12  ;;  %vm1120_vm13 = vweird.f32 %v1871_v26 }
 0x270   :  { %v1116_v2 = vsub.f32 1.0, %v1115_v0  ;;  %v1190_v48 = vmul.f32 %v1189_v50, %v3066_v55  ;;  %v3111_v28 = vmul.f32 0.70710677, %v3102_v51  ;;  %v1103_v59 = vmul.f32 %v1102_v46, %v2978_v34  ;;  %v1544_v0 = vpop.f32.mrf.mxu1 }
 0x271   :  { %1443 = vmatmul.f32.gmra.mxu3 %v1317_v19  ;;  %1508 = vmatmul.f32.gmra.mxu0 %v1317_v19  ;;  %vm1119_vm14 = vweird.f32 %v3080_v6  ;;  %vm3115_vm15 = vcmp.eq.f32.partialorder %v1123_v8, 8.507059e+37  ;;  %v1226_v23 = vmul.f32 %v1225_v58, %v3083_v4  ;;  %v1178_v42 = vadd.f32 0.05243302, %v1177_v7  ;;  %v1609_v58 = vpop.f32.mrf.mxu2 }
 0x272   :  { %1573 = vmatmul.f32.gmra.mxu1 %v1317_v19  ;;  %1638 = vmatmul.f32.gmra.mxu2 %v1317_v19  ;;  %v1117_v29 = vmul.f32 %v1871_v26, %v1116_v2  ;;  %v1191_v1 = vadd.f32 0.4994258, %v1190_v48  ;;  %v1251_v39 = vmul.f32 %v3111_v28, %v3111_v28  ;;  %vm1121_vm0 = vmor %vm1119_vm14, %vm1120_vm13  ;;  %v1126_v24 = vor.u32 1.1754944e-38, %v1125_v41  ;;  %v1479_v19 = vpop.f32.mrf.mxu0 }
 0x273   :  { %v1216_v34 = vadd.f32 0.0036580483, %v1215_v5  ;;  %v1227_v49 = vadd.f32 0.014752088, %v1226_v23  ;;  %v1142_v33 = vadd.f32 1.1283791, %v1141_v56  ;;  %v1179_v60 = vmul.f32 %v1178_v42, %v3066_v55  ;;  %v1414_v5 = vpop.f32.mrf.mxu3 }
 0x274   :  { %v1873_v14 = vpop.eup %1872  ;;  %v1118_v61 = vadd.f32 %v1871_v26, %v1117_v29  ;;  %v1163_v25 = vand.u32 2147483647, %v3095_v11  ;;  %v1192_v40 = vmul.f32 %v1191_v1, %v3066_v55  ;;  %v3128_v17 = vmin.f32 %v1251_v39, 16.0 }
 0x275   :  { %v1155_v52 = vmul.f32 %v1873_v14, %v3095_v11  ;;  %v1228_v54 = vmul.f32 %v1227_v49, %v3083_v4  ;;  %v1165_v16 = vand.u32 2147483648, %v3095_v11  ;;  %vm1160_vm1 = vweird.f32 %v1873_v14 }
 0x276   :  { %v1122_v6 = vsel %vm1121_vm0, %v1871_v26, %v1118_v61  ;;  %v3132_v37 = vadd.f32 1.0, %v1192_v40  ;;  %v1217_v21 = vmul.f32 %v1216_v34, %v3083_v4  ;;  %v630_v13 = vmul.f32 0.5, %v2956_v44 }
 0x277   :  { %v1127_v9 = vsel %vm3115_vm15, %v1126_v24, %v1122_v6  ;;  %v1156_v57 = vsub.f32 1.0, %v1155_v52  ;;  %v1229_v45 = vadd.f32 0.112945676, %v1228_v54  ;;  %vm1159_vm2 = vweird.f32 %v3095_v11  ;;  %v1387_v11 = vld [vmem:[%s3267_s7] sm:$0xf]  ;;  %s2016_s7 = smov [#allocation10]  }
 0x278   :  { %v1128_v15 = vmul.f32 %v1127_v9, %v1103_v59  ;;  %1874 = vrcp.f32 %v3132_v37  ;;  %vm3138_vm3 = vcmp.eq.f32.partialorder %v1163_v25, 8.507059e+37  ;;  %v1253_v47 = vmul.f32 2.1237322e-06, %v3128_v17  ;;  %vm1161_vm4 = vmor %vm1159_vm2, %vm1160_vm1  ;;  %s1725_s21 = sshll.u32 %s2016_s7, 4  ;;  %s1726_s21 = int_to_ptr.vmem [resolvable:$true] %s1725_s21 }
 0x279   :  { %v1157_v63 = vmul.f32 %v1873_v14, %v1156_v57  ;;  %v1230_v27 = vmul.f32 %v1229_v45, %v3083_v4  ;;  %v1143_v26 = vmul.f32 %v1142_v33, %v3004_v35  ;;  %v1166_v53 = vor.u32 1.1754944e-38, %v1165_v16 }
 0x27a   :  { %v1769_v10 = vclamps-f32 %v1128_v15, 1.0  ;;  %v1180_v44 = vadd.f32 0.18741608, %v1179_v60  ;;  %v1218_v20 = vadd.f32 0.05243302, %v1217_v21  ;;  %v3151_v7 = vperm.slane %v1387_v11, 1 }
 0x27b   :  { %v1158_v38 = vadd.f32 %v1873_v14, %v1157_v63  ;;  %v1231_v12 = vadd.f32 0.4994258, %v1230_v27  ;;  %v1264_v46 = vmul.f32 3.8918573e-05, %v3128_v17  ;;  %v3153_v35 = vperm.slane %v1387_v11, 2 }
 0x27c   :  { %v1302_v36 = vadd.f32 1.0, %v1769_v10  ;;  %v3156_v56 = vperm.slane %v1387_v11, 0  ;;  %v1254_v29 = vadd.f32 0.00028619796, %v1253_v47  ;;  %v1181_v59 = vmul.f32 %v1180_v44, %v3066_v55 }
 0x27d   :  { %v1162_v30 = vsel %vm1161_vm4, %v1873_v14, %v1158_v38  ;;  %v1232_v41 = vmul.f32 %v1231_v12, %v3083_v4  ;;  %v1480_v31 = vadd.f32 %v1479_v19, %v3151_v7  ;;  %v1545_v23 = vadd.f32 %v1544_v0, %v3153_v35 }
 0x27e   :  { %v1318_v8 = vmul.f32 %v1302_v36, %v630_v13  ;;  %v1167_v2 = vsel %vm3138_vm3, %v1166_v53, %v1162_v30  ;;  %v1875_v48 = vpop.eup %1874  ;;  %v3161_v14 = vperm.slane %v1387_v11, 3  ;;  %v631_v61 = vmul.f32 0.5, %v2987_v22 }
 0x27f   :  { %v1168_v50 = vmul.f32 %v1167_v2, %v1143_v26  ;;  %v1195_v1 = vmul.f32 %v1875_v48, %v3132_v37  ;;  %v3165_v39 = vadd.f32 1.0, %v1232_v41  ;;  %v1219_v24 = vmul.f32 %v1218_v20, %v3083_v4  ;;  %1658 = vst [vmem:[#allocation10 + $0x8] sm:$0xff] %v1480_v31  ;;  %v1547_v2 = vpop.f32.mrf.mxu1 }
 0x280   :  { %1446 = vmatmul.f32.gmra.mxu3 %v1318_v8  ;;  %1511 = vmatmul.f32.gmra.mxu0 %v1318_v8  ;;  %v1415_v55 = vadd.f32 %v1414_v5, %v3156_v56  ;;  %v1610_v52 = vadd.f32 %v1609_v58, %v3161_v14  ;;  %v1265_v34 = vadd.f32 0.001143296, %v1264_v46  ;;  %1659 = vst [vmem:[#allocation10 + $0x10] sm:$0xff] %v1545_v23  ;;  %v1182_v33 = vadd.f32 1.1283791, %v1181_v59  ;;  %v1417_v58 = vpop.f32.mrf.mxu3 }
 0x281   :  { %1576 = vmatmul.f32.gmra.mxu1 %v1318_v8  ;;  %1641 = vmatmul.f32.gmra.mxu2 %v1318_v8  ;;  %v1770_v42 = vclamps-f32 %v1168_v50, 1.0  ;;  %v1196_v6 = vsub.f32 1.0, %v1195_v1  ;;  %1876 = vrcp.f32 %v3165_v39  ;;  %v1255_v22 = vmul.f32 %v1254_v29, %v3128_v17  ;;  %v1482_v8 = vpop.f32.mrf.mxu0  ;;  %v1612_v29 = vpop.f32.mrf.mxu2 }
 0x282   :  { %v1205_v25 = vand.u32 2147483648, %v3132_v37  ;;  %1657 = vst [vmem:[#allocation10] sm:$0xff] %v1415_v55  ;;  %v1266_v40 = vmul.f32 %v1265_v34, %v3128_v17  ;;  %vm1200_vm5 = vweird.f32 %v1875_v48  ;;  %v1203_v54 = vand.u32 2147483647, %v3132_v37 }
 0x283   :  { %v1303_v49 = vadd.f32 1.0, %v1770_v42  ;;  %v1197_v57 = vmul.f32 %v1875_v48, %v1196_v6  ;;  %1660 = vst [vmem:[#allocation10 + $0x18] sm:$0xff] %v1610_v52  ;;  %v1220_v15 = vadd.f32 0.18741608, %v1219_v24  ;;  %vm1199_vm6 = vweird.f32 %v3132_v37 }
 0x284   :  { %v1267_v16 = vadd.f32 0.014752088, %v1266_v40  ;;  %v1256_v63 = vadd.f32 0.0036580483, %v1255_v22  ;;  %vm1201_vm7 = vmor %vm1199_vm6, %vm1200_vm5  ;;  %v1206_v21 = vor.u32 1.1754944e-38, %v1205_v25  ;;  %v1183_v10 = vmul.f32 %v1182_v33, %v3048_v3 }
 0x285   :  { %v1319_v9 = vmul.f32 %v1303_v49, %v631_v61  ;;  %v1198_v60 = vadd.f32 %v1875_v48, %v1197_v57  ;;  %vm1204_vm8 = vcmp.eq.f32.partialorder %v1203_v54, 8.507059e+37  ;;  %v1221_v27 = vmul.f32 %v1220_v15, %v3083_v4 }
 0x286   :  { %v1268_v45 = vmul.f32 %v1267_v16, %v3128_v17  ;;  %v1257_v36 = vmul.f32 %v1256_v63, %v3128_v17  ;;  %v1245_v44 = vand.u32 2147483648, %v3165_v39  ;;  %v632_v11 = vmul.f32 0.5, %v3033_v32 }
 0x287   :  { %v1877_v13 = vpop.eup %1876  ;;  %v1202_v38 = vsel %vm1201_vm7, %v1875_v48, %v1198_v60  ;;  %v1222_v3 = vadd.f32 1.1283791, %v1221_v27  ;;  %v1243_v19 = vand.u32 2147483647, %v3165_v39  ;;  %vm1239_vm10 = vweird.f32 %v3165_v39 }
 0x288   :  { %1449 = vmatmul.f32.gmra.mxu3 %v1319_v9  ;;  %1514 = vmatmul.f32.gmra.mxu0 %v1319_v9  ;;  %v1207_v43 = vsel %vm1204_vm8, %v1206_v21, %v1202_v38  ;;  %v1235_v47 = vmul.f32 %v1877_v13, %v3165_v39  ;;  %v1269_v26 = vadd.f32 0.112945676, %v1268_v45  ;;  %vm1240_vm9 = vweird.f32 %v1877_v13  ;;  %v1420_v40 = vpop.f32.mrf.mxu3 }
 0x289   :  { %1579 = vmatmul.f32.gmra.mxu1 %v1319_v9  ;;  %1644 = vmatmul.f32.gmra.mxu2 %v1319_v9  ;;  %v1208_v37 = vmul.f32 %v1207_v43, %v1183_v10  ;;  %v1258_v0 = vadd.f32 0.05243302, %v1257_v36  ;;  %v1246_v41 = vor.u32 1.1754944e-38, %v1245_v44  ;;  %v1483_v5 = vadd.f32 %v1482_v8, %v3151_v7  ;;  %vm1241_vm11 = vmor %vm1239_vm10, %vm1240_vm9  ;;  %v1485_v49 = vpop.f32.mrf.mxu0  ;;  %v1615_v9 = vpop.f32.mrf.mxu2 }
 0x28a   :  { %v1236_v53 = vsub.f32 1.0, %v1235_v47  ;;  %v1270_v20 = vmul.f32 %v1269_v26, %v3128_v17  ;;  %v1548_v32 = vadd.f32 %v1547_v2, %v3153_v35  ;;  %v1418_v31 = vadd.f32 %v1417_v58, %v3156_v56 }
 0x28b   :  { %v1771_v30 = vclamps-f32 %v1208_v37, 1.0  ;;  %v1613_v23 = vadd.f32 %v1612_v29, %v3161_v14  ;;  %v1223_v61 = vmul.f32 %v1222_v3, %v3070_v18  ;;  %vm1244_vm12 = vcmp.eq.f32.partialorder %v1243_v19, 8.507059e+37  ;;  %1662 = vst [vmem:[#allocation10 + $0x28] sm:$0xff] %v1483_v5  ;;  %v1550_v18 = vpop.f32.mrf.mxu1 }
 0x28c   :  { %v1237_v12 = vmul.f32 %v1877_v13, %v1236_v53  ;;  %v1271_v46 = vadd.f32 0.4994258, %v1270_v20  ;;  %v1259_v39 = vmul.f32 %v1258_v0, %v3128_v17  ;;  %1663 = vst [vmem:[#allocation10 + $0x30] sm:$0xff] %v1548_v32  ;;  %v633_v6 = vmul.f32 0.5, %v3056_v62 }
 0x28d   :  { %v1304_v4 = vadd.f32 1.0, %v1771_v30  ;;  %1661 = vst [vmem:[#allocation10 + $0x20] sm:$0xff] %v1418_v31  ;;  %v1486_v33 = vadd.f32 %v1485_v49, %v3151_v7  ;;  %v1551_v25 = vadd.f32 %v1550_v18, %v3153_v35  ;;  %v1421_v57 = vadd.f32 %v1420_v40, %v3156_v56 }
 0x28e   :  { %v1238_v50 = vadd.f32 %v1877_v13, %v1237_v12  ;;  %v1272_v59 = vmul.f32 %v1271_v46, %v3128_v17  ;;  %1664 = vst [vmem:[#allocation10 + $0x38] sm:$0xff] %v1613_v23  ;;  %v1260_v34 = vadd.f32 0.18741608, %v1259_v39  ;;  %v1616_v54 = vadd.f32 %v1615_v9, %v3161_v14 }
 0x28f   :  { %v1320_v48 = vmul.f32 %v1304_v4, %v632_v11  ;;  %1666 = vst [vmem:[#allocation10 + $0x48] sm:$0xff] %v1486_v33  ;;  %v634_v8 = vmul.f32 0.5, %v3102_v51 }
 0x290   :  { %v1242_v42 = vsel %vm1241_vm11, %v1877_v13, %v1238_v50  ;;  %v1273_v24 = vadd.f32 1.0, %v1272_v59  ;;  %v1261_v60 = vmul.f32 %v1260_v34, %v3128_v17  ;;  %1667 = vst [vmem:[#allocation10 + $0x50] sm:$0xff] %v1551_v25 }
 0x291   :  { %1452 = vmatmul.f32.gmra.mxu3 %v1320_v48  ;;  %1517 = vmatmul.f32.gmra.mxu0 %v1320_v48  ;;  %v1247_v1 = vsel %vm1244_vm12, %v1246_v41, %v1242_v42  ;;  %1665 = vst [vmem:[#allocation10 + $0x40] sm:$0xff] %v1421_v57  ;;  %v1488_v10 = vpop.f32.mrf.mxu0 }
 0x292   :  { %1582 = vmatmul.f32.gmra.mxu1 %v1320_v48  ;;  %1647 = vmatmul.f32.gmra.mxu2 %v1320_v48  ;;  %v1248_v55 = vmul.f32 %v1247_v1, %v1223_v61  ;;  %1878 = vrcp.f32 %v1273_v24  ;;  %1668 = vst [vmem:[#allocation10 + $0x58] sm:$0xff] %v1616_v54  ;;  %v1262_v21 = vadd.f32 1.1283791, %v1261_v60  ;;  %v1283_v45 = vand.u32 2147483647, %v1273_v24 }
 0x293   :  { %v1285_v13 = vand.u32 2147483648, %v1273_v24  ;;  %v1553_v38 = vpop.f32.mrf.mxu1  ;;  %v1489_v27 = vadd.f32 %v1488_v10, %v3151_v7  ;;  %vm1279_vm14 = vweird.f32 %v1273_v24 }
 0x294   :  { %v1772_v52 = vclamps-f32 %v1248_v55, 1.0  ;;  %v1554_v17 = vadd.f32 %v1553_v38, %v3153_v35  ;;  %v1263_v11 = vmul.f32 %v1262_v21, %v3111_v28  ;;  %vm1284_vm0 = vcmp.eq.f32.partialorder %v1283_v45, 8.507059e+37 }
 0x295   :  { %1670 = vst [vmem:[#allocation10 + $0x68] sm:$0xff] %v1489_v27  ;;  %v1286_v44 = vor.u32 1.1754944e-38, %v1285_v13 }
 0x296   :  { %v1305_v22 = vadd.f32 1.0, %v1772_v52  ;;  %v1423_v47 = vpop.f32.mrf.mxu3  ;;  %1671 = vst [vmem:[#allocation10 + $0x70] sm:$0xff] %v1554_v17 }
 0x297   :  { %v1618_v37 = vpop.f32.mrf.mxu2  ;;  %v1424_v36 = vadd.f32 %v1423_v47, %v3156_v56 }
 0x298   :  { %v1321_v15 = vmul.f32 %v1305_v22, %v633_v6  ;;  %v1879_v16 = vpop.eup %1878  ;;  %v1619_v26 = vadd.f32 %v1618_v37, %v3161_v14 }
 0x299   :  { %v1275_v62 = vmul.f32 %v1879_v16, %v1273_v24  ;;  %vm1280_vm13 = vweird.f32 %v1879_v16  ;;  %1669 = vst [vmem:[#allocation10 + $0x60] sm:$0xff] %v1424_v36 }
 0x29a   :  { %1455 = vmatmul.f32.gmra.mxu3 %v1321_v15  ;;  %1520 = vmatmul.f32.gmra.mxu0 %v1321_v15  ;;  %vm1281_vm15 = vmor %vm1279_vm14, %vm1280_vm13  ;;  %1672 = vst [vmem:[#allocation10 + $0x78] sm:$0xff] %v1619_v26 }
 0x29b   :  { %1585 = vmatmul.f32.gmra.mxu1 %v1321_v15  ;;  %1650 = vmatmul.f32.gmra.mxu2 %v1321_v15  ;;  %v1276_v63 = vsub.f32 1.0, %v1275_v62 }
 0x29d   :  { %v1277_v43 = vmul.f32 %v1879_v16, %v1276_v63 }
 0x29f   :  { %v1278_v53 = vadd.f32 %v1879_v16, %v1277_v43 }
 0x2a1   :  { %v1282_v30 = vsel %vm1281_vm15, %v1879_v16, %v1278_v53 }
 0x2a2   :  { %v1287_v20 = vsel %vm1284_vm0, %v1286_v44, %v1282_v30 }
 0x2a3   :  { %v1288_v3 = vmul.f32 %v1287_v20, %v1263_v11 }
 0x2a5   :  { %v1773_v4 = vclamps-f32 %v1288_v3, 1.0 }
 0x2a7   :  { %v1306_v2 = vadd.f32 1.0, %v1773_v4 }
 0x2a8   :  { %v1491_v12 = vpop.f32.mrf.mxu0 }
 0x2a9   :  { %v1556_v19 = vpop.f32.mrf.mxu1  ;;  %v1492_v0 = vadd.f32 %v1491_v12, %v3151_v7  ;;  %v1322_v5 = vmul.f32 %v1306_v2, %v634_v8 }
 0x2aa   :  { %v1557_v46 = vadd.f32 %v1556_v19, %v3153_v35 }
 0x2ab   :  { %1674 = vst [vmem:[#allocation10 + $0x88] sm:$0xff] %v1492_v0  ;;  %1458 = vmatmul.f32.gmra.mxu3 %v1322_v5  ;;  %1523 = vmatmul.f32.gmra.mxu0 %v1322_v5 }
 0x2ac   :  { %1675 = vst [vmem:[#allocation10 + $0x90] sm:$0xff] %v1557_v46  ;;  %1588 = vmatmul.f32.gmra.mxu1 %v1322_v5  ;;  %1653 = vmatmul.f32.gmra.mxu2 %v1322_v5 }
 0x2ae   :  { %v1426_v50 = vpop.f32.mrf.mxu3 }
 0x2af   :  { %v1427_v28 = vadd.f32 %v1426_v50, %v3156_v56  ;;  %v1621_v41 = vpop.f32.mrf.mxu2 }
 0x2b0   :  { %v1622_v32 = vadd.f32 %v1621_v41, %v3161_v14 }
 0x2b1   :  { %1673 = vst [vmem:[#allocation10 + $0x80] sm:$0xff] %v1427_v28 }
 0x2b2   :  { %1676 = vst [vmem:[#allocation10 + $0x98] sm:$0xff] %v1622_v32 }
 0x2b9   :  { %v1494_v58 = vpop.f32.mrf.mxu0 }
 0x2ba   :  { %v1495_v29 = vadd.f32 %v1494_v58, %v3151_v7  ;;  %v1559_v51 = vpop.f32.mrf.mxu1 }
 0x2bb   :  { %v1560_v48 = vadd.f32 %v1559_v51, %v3153_v35 }
 0x2bc   :  { %1678 = vst [vmem:[#allocation10 + $0xa8] sm:$0xff] %v1495_v29 }
 0x2bd   :  { %1679 = vst [vmem:[#allocation10 + $0xb0] sm:$0xff] %v1560_v48 }
 0x2bf   :  { %v1429_v59 = vpop.f32.mrf.mxu3 }
 0x2c0   :  { %v1430_v31 = vadd.f32 %v1429_v59, %v3156_v56  ;;  %v1624_v23 = vpop.f32.mrf.mxu2 }
 0x2c1   :  { %v1625_v61 = vadd.f32 %v1624_v23, %v3161_v14 }
 0x2c2   :  { %1677 = vst [vmem:[#allocation10 + $0xa0] sm:$0xff] %v1430_v31 }
 0x2c3   :  { %1680 = vst [vmem:[#allocation10 + $0xb8] sm:$0xff] %v1625_v61 }
 0x2c4   :  { %v1497_v42 = vpop.f32.mrf.mxu0 }
 0x2c5   :  { %v1498_v1 = vadd.f32 %v1497_v42, %v3151_v7  ;;  %v1562_v39 = vpop.f32.mrf.mxu1 }
 0x2c6   :  { %v1563_v24 = vadd.f32 %v1562_v39, %v3153_v35 }
 0x2c7   :  { %1682 = vst [vmem:[#allocation10 + $0xc8] sm:$0xff] %v1498_v1 }
 0x2c8   :  { %1683 = vst [vmem:[#allocation10 + $0xd0] sm:$0xff] %v1563_v24 }
 0x2ca   :  { %v1432_v55 = vpop.f32.mrf.mxu3 }
 0x2cb   :  { %v1433_v52 = vadd.f32 %v1432_v55, %v3156_v56  ;;  %v1627_v34 = vpop.f32.mrf.mxu2 }
 0x2cc   :  { %v1628_v49 = vadd.f32 %v1627_v34, %v3161_v14 }
 0x2cd   :  { %1681 = vst [vmem:[#allocation10 + $0xc0] sm:$0xff] %v1433_v52 }
 0x2ce   :  { %1684 = vst [vmem:[#allocation10 + $0xd8] sm:$0xff] %v1628_v49 }
 0x2d0   :  { %v1500_v18 = vpop.f32.mrf.mxu0 }
 0x2d1   :  { %v1501_v6 = vadd.f32 %v1500_v18, %v3151_v7  ;;  %v1565_v22 = vpop.f32.mrf.mxu1 }
 0x2d2   :  { %v1566_v33 = vadd.f32 %v1565_v22, %v3153_v35 }
 0x2d3   :  { %1686 = vst [vmem:[#allocation10 + $0xe8] sm:$0xff] %v1501_v6 }
 0x2d4   :  { %1687 = vst [vmem:[#allocation10 + $0xf0] sm:$0xff] %v1566_v33 }
 0x2d6   :  { %v1435_v25 = vpop.f32.mrf.mxu3 }
 0x2d7   :  { %v1436_v40 = vadd.f32 %v1435_v25, %v3156_v56  ;;  %v1630_v9 = vpop.f32.mrf.mxu2 }
 0x2d8   :  { %v1631_v57 = vadd.f32 %v1630_v9, %v3161_v14 }
 0x2d9   :  { %1685 = vst [vmem:[#allocation10 + $0xe0] sm:$0xff] %v1436_v40 }
 0x2da   :  { %1688 = vst [vmem:[#allocation10 + $0xf8] sm:$0xff] %v1631_v57 }
 0x2dc   :  { %v1503_v54 = vpop.f32.mrf.mxu0 }
 0x2dd   :  { %v1504_v15 = vadd.f32 %v1503_v54, %v3151_v7  ;;  %v1568_v16 = vpop.f32.mrf.mxu1 }
 0x2de   :  { %v1569_v60 = vadd.f32 %v1568_v16, %v3153_v35 }
 0x2df   :  { %1690 = vst [vmem:[#allocation10 + $0x108] sm:$0xff] %v1504_v15 }
 0x2e0   :  { %1691 = vst [vmem:[#allocation10 + $0x110] sm:$0xff] %v1569_v60 }
 0x2e2   :  { %v1438_v62 = vpop.f32.mrf.mxu3 }
 0x2e3   :  { %v1439_v63 = vadd.f32 %v1438_v62, %v3156_v56  ;;  %v1633_v21 = vpop.f32.mrf.mxu2 }
 0x2e4   :  { %v1634_v45 = vadd.f32 %v1633_v21, %v3161_v14  ;;  %v1506_v13 = vpop.f32.mrf.mxu0 }
 0x2e5   :  { %1689 = vst [vmem:[#allocation10 + $0x100] sm:$0xff] %v1439_v63  ;;  %v1507_v10 = vadd.f32 %v1506_v13, %v3151_v7  ;;  %v1571_v38 = vpop.f32.mrf.mxu1 }
 0x2e6   :  { %1692 = vst [vmem:[#allocation10 + $0x118] sm:$0xff] %v1634_v45  ;;  %v1572_v43 = vadd.f32 %v1571_v38, %v3153_v35 }
 0x2e7   :  { %1694 = vst [vmem:[#allocation10 + $0x128] sm:$0xff] %v1507_v10 }
 0x2e8   :  { %1695 = vst [vmem:[#allocation10 + $0x130] sm:$0xff] %v1572_v43 }
 0x2ea   :  { %v1441_v27 = vpop.f32.mrf.mxu3 }
 0x2eb   :  { %v1442_v17 = vadd.f32 %v1441_v27, %v3156_v56  ;;  %v1636_v47 = vpop.f32.mrf.mxu2 }
 0x2ec   :  { %v1637_v37 = vadd.f32 %v1636_v47, %v3161_v14 }
 0x2ed   :  { %1693 = vst [vmem:[#allocation10 + $0x120] sm:$0xff] %v1442_v17 }
 0x2ee   :  { %v1509_v36 = vpop.f32.mrf.mxu0  ;;  %1696 = vst [vmem:[#allocation10 + $0x138] sm:$0xff] %v1637_v37 }
 0x2ef   :  { %v1510_v26 = vadd.f32 %v1509_v36, %v3151_v7  ;;  %v1574_v53 = vpop.f32.mrf.mxu1 }
 0x2f0   :  { %v1575_v44 = vadd.f32 %v1574_v53, %v3153_v35 }
 0x2f1   :  { %1698 = vst [vmem:[#allocation10 + $0x148] sm:$0xff] %v1510_v26 }
 0x2f2   :  { %1699 = vst [vmem:[#allocation10 + $0x150] sm:$0xff] %v1575_v44 }
 0x2f4   :  { %v1444_v11 = vpop.f32.mrf.mxu3 }
 0x2f5   :  { %v1445_v30 = vadd.f32 %v1444_v11, %v3156_v56  ;;  %v1639_v20 = vpop.f32.mrf.mxu2 }
 0x2f6   :  { %v1640_v3 = vadd.f32 %v1639_v20, %v3161_v14 }
 0x2f7   :  { %1697 = vst [vmem:[#allocation10 + $0x140] sm:$0xff] %v1445_v30 }
 0x2f8   :  { %1700 = vst [vmem:[#allocation10 + $0x158] sm:$0xff] %v1640_v3 }
 0x2fd   :  { %v1512_v12 = vpop.f32.mrf.mxu0 }
 0x2fe   :  { %v1513_v19 = vadd.f32 %v1512_v12, %v3151_v7  ;;  %v1577_v4 = vpop.f32.mrf.mxu1 }
 0x2ff   :  { %v1578_v0 = vadd.f32 %v1577_v4, %v3153_v35 }
 0x300   :  { %1702 = vst [vmem:[#allocation10 + $0x168] sm:$0xff] %v1513_v19 }
 0x301   :  { %1703 = vst [vmem:[#allocation10 + $0x170] sm:$0xff] %v1578_v0 }
 0x303   :  { %v1447_v46 = vpop.f32.mrf.mxu3 }
 0x304   :  { %v1448_v8 = vadd.f32 %v1447_v46, %v3156_v56  ;;  %v1642_v2 = vpop.f32.mrf.mxu2 }
 0x305   :  { %v1643_v50 = vadd.f32 %v1642_v2, %v3161_v14  ;;  %v1515_v28 = vpop.f32.mrf.mxu0 }
 0x306   :  { %1701 = vst [vmem:[#allocation10 + $0x160] sm:$0xff] %v1448_v8  ;;  %v1516_v41 = vadd.f32 %v1515_v28, %v3151_v7  ;;  %v1580_v5 = vpop.f32.mrf.mxu1 }
 0x307   :  { %1704 = vst [vmem:[#allocation10 + $0x178] sm:$0xff] %v1643_v50  ;;  %v1581_v32 = vadd.f32 %v1580_v5, %v3153_v35 }
 0x308   :  { %1706 = vst [vmem:[#allocation10 + $0x188] sm:$0xff] %v1516_v41 }
 0x309   :  { %1707 = vst [vmem:[#allocation10 + $0x190] sm:$0xff] %v1581_v32 }
 0x30b   :  { %v1450_v58 = vpop.f32.mrf.mxu3 }
 0x30c   :  { %v1451_v29 = vadd.f32 %v1450_v58, %v3156_v56  ;;  %v1645_v51 = vpop.f32.mrf.mxu2 }
 0x30d   :  { %v1646_v48 = vadd.f32 %v1645_v51, %v3161_v14 }
 0x30e   :  { %1705 = vst [vmem:[#allocation10 + $0x180] sm:$0xff] %v1451_v29  ;;  %v1518_v59 = vpop.f32.mrf.mxu0 }
 0x30f   :  { %1708 = vst [vmem:[#allocation10 + $0x198] sm:$0xff] %v1646_v48  ;;  %v1519_v31 = vadd.f32 %v1518_v59, %v3151_v7  ;;  %v1583_v23 = vpop.f32.mrf.mxu1 }
 0x310   :  { %v1584_v61 = vadd.f32 %v1583_v23, %v3153_v35 }
 0x311   :  { %1710 = vst [vmem:[#allocation10 + $0x1a8] sm:$0xff] %v1519_v31 }
 0x312   :  { %1711 = vst [vmem:[#allocation10 + $0x1b0] sm:$0xff] %v1584_v61 }
 0x314   :  { %v1453_v42 = vpop.f32.mrf.mxu3 }
 0x315   :  { %v1454_v1 = vadd.f32 %v1453_v42, %v3156_v56  ;;  %v1648_v39 = vpop.f32.mrf.mxu2 }
 0x316   :  { %v1649_v24 = vadd.f32 %v1648_v39, %v3161_v14 }
 0x317   :  { %1709 = vst [vmem:[#allocation10 + $0x1a0] sm:$0xff] %v1454_v1  ;;  %v1521_v55 = vpop.f32.mrf.mxu0 }
 0x318   :  { %1712 = vst [vmem:[#allocation10 + $0x1b8] sm:$0xff] %v1649_v24  ;;  %v1522_v52 = vadd.f32 %v1521_v55, %v3151_v7  ;;  %v1586_v34 = vpop.f32.mrf.mxu1 }
 0x319   :  { %v1587_v49 = vadd.f32 %v1586_v34, %v3153_v35 }
 0x31a   :  { %1714 = vst [vmem:[#allocation10 + $0x1c8] sm:$0xff] %v1522_v52 }
 0x31b   :  { %1715 = vst [vmem:[#allocation10 + $0x1d0] sm:$0xff] %v1587_v49 }
 0x31d   :  { %v1456_v18 = vpop.f32.mrf.mxu3 }
 0x31e   :  { %v1457_v6 = vadd.f32 %v1456_v18, %v3156_v56  ;;  %v1651_v22 = vpop.f32.mrf.mxu2 }
 0x31f   :  { %v1652_v33 = vadd.f32 %v1651_v22, %v3161_v14 }
 0x320   :  { %1713 = vst [vmem:[#allocation10 + $0x1c0] sm:$0xff] %v1457_v6 }
 0x321   :  { %1716 = vst [vmem:[#allocation10 + $0x1d8] sm:$0xff] %v1652_v33 }
 0x328   :  { %v1524_v25 = vpop.f32.mrf.mxu0 }
 0x329   :  { %v1525_v40 = vadd.f32 %v1524_v25, %v3151_v7  ;;  %v1589_v9 = vpop.f32.mrf.mxu1 }
 0x32a   :  { %v1590_v57 = vadd.f32 %v1589_v9, %v3153_v35 }
 0x32b   :  { %1718 = vst [vmem:[#allocation10 + $0x1e8] sm:$0xff] %v1525_v40 }
 0x32c   :  { %1719 = vst [vmem:[#allocation10 + $0x1f0] sm:$0xff] %v1590_v57 }
 0x32e   :  { %v1459_v54 = vpop.f32.mrf.mxu3 }
 0x32f   :  { %v1460_v15 = vadd.f32 %v1459_v54, %v3156_v56  ;;  %v1654_v16 = vpop.f32.mrf.mxu2 }
 0x330   :  { %v1655_v60 = vadd.f32 %v1654_v16, %v3161_v14 }
 0x331   :  { %1717 = vst [vmem:[#allocation10 + $0x1e0] sm:$0xff] %v1460_v15 }
 0x332   :  { %1720 = vst [vmem:[#allocation10 + $0x1f8] sm:$0xff] %v1655_v60 }
 0x333   :  { %1733 = dma.vmem_to_hbm [thread:$0]  %s1726_s21, 8192, %s1728_s4, [#allocation4], %s2014_s23, %s2014_s23, %s2015_s24  }
 0x334   :  { %2008 = dma.done.wait [#allocation4], 8192  }
 0x335   :  { %2009 = vsyncadd [#allocation4], 4294959104 }
 0x336   :  { %1738 = vsyncpa [#allocation3], 1 }
 0x337   :  { %1739 = vsyncpa [#allocation6], 1 }
 0x338   :  { %1740 = vsyncpa [#allocation9], 1 }
 0x339   :  { %1741 = vsyncpa [#allocation4], 1 }

</bundles_post_ra>
